<compile_context>
chip_gen: v6e
topology: v6e:2x2x1
jax: 0.10.0
libtpu: 0.0.40
codegen_flags: <defaults>
</compile_context>

<pallas_src>
import jax
import jax.numpy as jnp
from jax.experimental import pallas as pl
from jax.experimental.pallas import tpu as pltpu

EMBED_DIM = 512
NUM_FEATURE_VECTOR = 3
NUM_CLASSES = 16  # stand-in for len(np.load('path/to/names.npy'))
LANE = 128


def _round_up(x, m):
    return (x + m - 1) // m * m


# -----------------------------------------------------------------------------
# Pallas kernel: K-streamed embedding projection + fused fc1/ReLU/fc2/sigmoid
# -----------------------------------------------------------------------------
def face_head_kernel(img_ref, feat_ref, we_ref, w1a_ref, w1b_ref, b1_ref,
                     w2_ref, b2_ref, out_ref, acc_ref):
    k = pl.program_id(1)

    @pl.when(k == 0)
    def _():
        acc_ref[...] = jnp.zeros_like(acc_ref)

    # Streamed K-tile of the backbone projection: (tb, tk) @ (tk, 512),
    # bf16 inputs, f32 accumulation on the MXU into a resident accumulator.
    acc_ref[...] += jnp.dot(img_ref[...], we_ref[...],
                            preferred_element_type=jnp.float32)

    # Epilogue: fc1 (split-weight concat) + ReLU + fc2 + sigmoid, only once
    # per batch tile on the final K step.
    @pl.when(k == pl.num_programs(1) - 1)
    def _():
        emb = acc_ref[...]
        h = (jnp.dot(emb, w1a_ref[...], preferred_element_type=jnp.float32)
             + jnp.dot(feat_ref[...], w1b_ref[...],
                       preferred_element_type=jnp.float32)
             + b1_ref[...])
        h = jnp.maximum(h, 0.0)  # ReLU (f32, VPU)
        logits = (jnp.dot(h, w2_ref[...], preferred_element_type=jnp.float32)
                  + b2_ref[...])
        out_ref[...] = jax.nn.sigmoid(logits)  # sigmoid (EUP, f32)


def custom_face_model_forward(img, features, params, *, tk=None, tb=None):
    """img: (B, C, H, W) float NCHW; features: (B, F) or (B,) float."""
    B = img.shape[0]

    # features.unsqueeze(1) if features.dim() == 1
    if features.ndim == 1:
        features = features[:, None]

    we, w1a, w1b, b1, w2, b2 = params
    K = we.shape[0]
    F = w1b.shape[0]
    num_classes = w2.shape[1]

    # Plain-JAX glue: flatten + dtype casts (bf16 activations/weight for the
    # big streamed matmul halves HBM traffic; accumulation stays f32).
    img_flat = img.reshape(B, -1).astype(jnp.bfloat16)
    features = features.astype(jnp.float32)
    we = we.astype(jnp.bfloat16)

    # ---- tile sizing --------------------------------------------------------
    # Batch tile: full batch if small, else 128-row tiles (parallel axis).
    if tb is None:
        tb = B if B <= 128 else 128
    B_pad = _round_up(B, tb)

    # K tile for the streamed backbone weight.  Default tk=2048 rows ->
    # (2048, 512) bf16 = 2 MiB per buffer, 4 MiB double-buffered: fits the
    # default scoped VMEM on v5e/v6e/v7x with plenty of headroom.
    if tk is None:
        tk = min(K, 2048)
    tk = min(tk, K)
    if tk < K:
        tk = max(LANE, (tk // LANE) * LANE)  # lane/sublane aligned tiles
    K_pad = _round_up(K, tk)

    # Lane-dense fc2 / output: pad num_classes up to a multiple of 128.
    n_pad = _round_up(num_classes, LANE)

    # ---- zero padding (does not change the math; sliced off below) ---------
    if K_pad != K:
        img_flat = jnp.pad(img_flat, ((0, 0), (0, K_pad - K)))
        we = jnp.pad(we, ((0, K_pad - K), (0, 0)))
    if B_pad != B:
        img_flat = jnp.pad(img_flat, ((0, B_pad - B), (0, 0)))
        features = jnp.pad(features, ((0, B_pad - B), (0, 0)))
    w2p = jnp.pad(w2, ((0, 0), (0, n_pad - num_classes)))
    b2p = jnp.pad(b2, ((0, 0), (0, n_pad - num_classes)))

    num_b = B_pad // tb
    num_k = K_pad // tk

    in_specs = [
        pl.BlockSpec((tb, tk), lambda b, k: (b, k)),                 # img_flat
        pl.BlockSpec((tb, F), lambda b, k: (b, 0)),                  # features
        pl.BlockSpec((tk, EMBED_DIM), lambda b, k: (k, 0)),          # We (streamed)
        pl.BlockSpec((EMBED_DIM, EMBED_DIM), lambda b, k: (0, 0)),   # w1a (resident)
        pl.BlockSpec((F, EMBED_DIM), lambda b, k: (0, 0)),           # w1b (resident)
        pl.BlockSpec((1, EMBED_DIM), lambda b, k: (0, 0)),           # b1
        pl.BlockSpec((EMBED_DIM, n_pad), lambda b, k: (0, 0)),       # w2
        pl.BlockSpec((1, n_pad), lambda b, k: (0, 0)),               # b2
    ]
    out_spec = pl.BlockSpec((tb, n_pad), lambda b, k: (b, 0))

    out = pl.pallas_call(
        face_head_kernel,
        out_shape=jax.ShapeDtypeStruct((B_pad, n_pad), jnp.float32),
        grid=(num_b, num_k),
        in_specs=in_specs,
        out_specs=out_spec,
        scratch_shapes=[pltpu.VMEM((tb, EMBED_DIM), jnp.float32)],
        compiler_params=pltpu.CompilerParams(
            dimension_semantics=("parallel", "arbitrary"),
            vmem_limit_bytes=48 * 1024 * 1024,  # headroom on v5e/v6e/v7x
        ),
    )(img_flat, features, we, w1a, w1b, b1, w2p, b2p)

    return out[:B, :num_classes]


# -----------------------------------------------------------------------------
# Deterministic parameter initialization (shapes from the module __init__)
# -----------------------------------------------------------------------------
def init_params(key, img_flat_dim, num_feature_vector=NUM_FEATURE_VECTOR,
                num_classes=NUM_CLASSES):
    k0, k1, k2, k3, k4 = jax.random.split(key, 5)
    # Stand-in "arcface" projection: img_flat -> 512 (bf16 streamed weight).
    we = (jax.random.normal(k0, (img_flat_dim, EMBED_DIM), jnp.float32)
          * 0.02).astype(jnp.bfloat16)
    # fc1: Linear(512 + num_feature_vector, 512), stored as (in, out); split
    # into the embedding part (512, 512) and the extra-features part (F, 512).
    w1 = jax.random.normal(k1, (EMBED_DIM + num_feature_vector, EMBED_DIM),
                           jnp.float32) * 0.02
    w1a = w1[:EMBED_DIM, :]
    w1b = w1[EMBED_DIM:, :]
    b1 = jax.random.normal(k2, (1, EMBED_DIM), jnp.float32) * 0.02
    # fc2: Linear(512, num_classes), stored as (in, out)
    w2 = jax.random.normal(k3, (EMBED_DIM, num_classes), jnp.float32) * 0.02
    b2 = jax.random.normal(k4, (1, num_classes), jnp.float32) * 0.02
    return (we, w1a, w1b, b1, w2, b2)


# -----------------------------------------------------------------------------
# Pure-JAX reference (same math, single un-tiled contraction)
# -----------------------------------------------------------------------------
def reference_forward(img, features, params):
    we, w1a, w1b, b1, w2, b2 = params
    B = img.shape[0]
    if features.ndim == 1:
        features = features[:, None]
    img_flat = img.reshape(B, -1).astype(jnp.bfloat16)
    emb = jnp.dot(img_flat, we.astype(jnp.bfloat16),
                  preferred_element_type=jnp.float32)
    x = jnp.concatenate([emb, features.astype(jnp.float32)], axis=1)
    w1 = jnp.concatenate([w1a, w1b], axis=0)
    h = jnp.maximum(x @ w1 + b1, 0.0)
    return jax.nn.sigmoid(h @ w2 + b2)


if __name__ == "__main__":
    key = jax.random.PRNGKey(0)
    k_img, k_feat, k_param = jax.random.split(key, 3)

    B, C, H, W = 2, 4, 16, 16
    img = jax.random.normal(k_img, (B, C, H, W), jnp.float32)
    features = jax.random.normal(k_feat, (B, NUM_FEATURE_VECTOR), jnp.float32)

    params = init_params(k_param, img_flat_dim=C * H * W)

    # tk=256 -> 4 K-steps at the toy size: exercises the accumulator init /
    # epilogue gating and the BlockSpec weight-streaming pipeline.
    out = custom_face_model_forward(img, features, params, tk=256)
    out = jax.block_until_ready(out)

    ref = reference_forward(img, features, params)

    assert out.shape == (B, NUM_CLASSES)
    assert bool(jnp.all(jnp.isfinite(out)))
    assert bool(jnp.all((out >= 0.0) & (out <= 1.0)))  # sigmoid range
    assert bool(jnp.allclose(out, ref, atol=2e-3, rtol=2e-3))
    print("KERNEL_OK")
</pallas_src>

<mosaic_0001>
module attributes {stable_mosaic.version = 11 : i64} {
  func.func @face_head_kernel(%arg0: i32, %arg1: i32, %arg2: memref<2x256xbf16, #tpu.memory_space<vmem>>, %arg3: memref<2x3xf32, #tpu.memory_space<vmem>>, %arg4: memref<256x512xbf16, #tpu.memory_space<vmem>>, %arg5: memref<512x512xf32, #tpu.memory_space<vmem>>, %arg6: memref<3x512xf32, #tpu.memory_space<vmem>>, %arg7: memref<1x512xf32, #tpu.memory_space<vmem>>, %arg8: memref<512x128xf32, #tpu.memory_space<vmem>>, %arg9: memref<1x128xf32, #tpu.memory_space<vmem>>, %arg10: memref<2x128xf32, #tpu.memory_space<vmem>>, %arg11: memref<2x512xf32, #tpu.memory_space<vmem>>) attributes {dimension_semantics = [#tpu.dimension_semantics<parallel>, #tpu.dimension_semantics<arbitrary>], iteration_bounds = array<i64: 1, 4>, scalar_prefetch = 0 : i64, scratch_operands = 1 : i64, tpu.core_type = #tpu.core_type<tc>, window_params = [{transform_indices = @transform_0, window_bounds = array<i64: 2, 256>}, {transform_indices = @transform_1, window_bounds = array<i64: 2, 3>}, {transform_indices = @transform_2, window_bounds = array<i64: 256, 512>}, {pipeline_mode = #tpu.pipeline_mode<synchronous>, transform_indices = @transform_3, window_bounds = array<i64: 512, 512>}, {pipeline_mode = #tpu.pipeline_mode<synchronous>, transform_indices = @transform_4, window_bounds = array<i64: 3, 512>}, {pipeline_mode = #tpu.pipeline_mode<synchronous>, transform_indices = @transform_5, window_bounds = array<i64: 1, 512>}, {pipeline_mode = #tpu.pipeline_mode<synchronous>, transform_indices = @transform_6, window_bounds = array<i64: 512, 128>}, {pipeline_mode = #tpu.pipeline_mode<synchronous>, transform_indices = @transform_7, window_bounds = array<i64: 1, 128>}, {transform_indices = @transform_8, window_bounds = array<i64: 2, 128>}]} {
    %c0_i32 = arith.constant 0 : i32
    %0 = arith.cmpi eq, %arg1, %c0_i32 : i32
    %1 = arith.extui %0 : i1 to i32
    %c0_i32_0 = arith.constant 0 : i32
    %2 = arith.cmpi ne, %1, %c0_i32_0 : i32
    scf.if %2 {
      %cst_9 = arith.constant 0.000000e+00 : f32
      %12 = vector.broadcast %cst_9 : f32 to vector<2x512xf32>
      %c0_10 = arith.constant 0 : index
      %c0_11 = arith.constant 0 : index
      %13 = vector.load %arg11[%c0_10, %c0_11] : memref<2x512xf32, #tpu.memory_space<vmem>>, vector<2x512xf32>
      tpu.vector_store %arg11[%c0_10, %c0_11], %12 {strides = array<i32>} : memref<2x512xf32, #tpu.memory_space<vmem>>, vector<2x512xf32>,
    } else {
    }
    %c0 = arith.constant 0 : index
    %c0_1 = arith.constant 0 : index
    %3 = vector.load %arg11[%c0, %c0_1] : memref<2x512xf32, #tpu.memory_space<vmem>>, vector<2x512xf32>
    %c0_2 = arith.constant 0 : index
    %c0_3 = arith.constant 0 : index
    %4 = vector.load %arg2[%c0_2, %c0_3] : memref<2x256xbf16, #tpu.memory_space<vmem>>, vector<2x256xbf16>
    %c0_4 = arith.constant 0 : index
    %c0_5 = arith.constant 0 : index
    %5 = vector.load %arg4[%c0_4, %c0_5] : memref<256x512xbf16, #tpu.memory_space<vmem>>, vector<256x512xbf16>
    %cst = arith.constant dense<0.000000e+00> : vector<2x512xf32>
    %6 = tpu.matmul %4, %5, %cst {dimension_numbers = #tpu.dot_dimension_numbers<[1], [0], [0], [1], [0, 0, 1, 1], [], []>} : vector<2x256xbf16>, vector<256x512xbf16>, vector<2x512xf32> -> vector<2x512xf32>
    %7 = arith.addf %3, %6 : vector<2x512xf32>
    %c0_6 = arith.constant 0 : index
    %c0_7 = arith.constant 0 : index
    %8 = vector.load %arg11[%c0_6, %c0_7] : memref<2x512xf32, #tpu.memory_space<vmem>>, vector<2x512xf32>
    tpu.vector_store %arg11[%c0_6, %c0_7], %7 {strides = array<i32>} : memref<2x512xf32, #tpu.memory_space<vmem>>, vector<2x512xf32>,
    %c3_i32 = arith.constant 3 : i32
    %9 = arith.cmpi eq, %arg1, %c3_i32 : i32
    %10 = arith.extui %9 : i1 to i32
    %c0_i32_8 = arith.constant 0 : i32
    %11 = arith.cmpi ne, %10, %c0_i32_8 : i32
    scf.if %11 {
      %c0_9 = arith.constant 0 : index
      %c0_10 = arith.constant 0 : index
      %12 = vector.load %arg11[%c0_9, %c0_10] : memref<2x512xf32, #tpu.memory_space<vmem>>, vector<2x512xf32>
      %c0_11 = arith.constant 0 : index
      %c0_12 = arith.constant 0 : index
      %13 = vector.load %arg5[%c0_11, %c0_12] : memref<512x512xf32, #tpu.memory_space<vmem>>, vector<512x512xf32>
      %cst_13 = arith.constant dense<0.000000e+00> : vector<2x512xf32>
      %14 = tpu.matmul %12, %13, %cst_13 {dimension_numbers = #tpu.dot_dimension_numbers<[1], [0], [0], [1], [0, 0, 1, 1], [], []>} : vector<2x512xf32>, vector<512x512xf32>, vector<2x512xf32> -> vector<2x512xf32>
      %c0_14 = arith.constant 0 : index
      %c0_15 = arith.constant 0 : index
      %15 = vector.load %arg3[%c0_14, %c0_15] : memref<2x3xf32, #tpu.memory_space<vmem>>, vector<2x3xf32>
      %c0_16 = arith.constant 0 : index
      %c0_17 = arith.constant 0 : index
      %16 = vector.load %arg6[%c0_16, %c0_17] : memref<3x512xf32, #tpu.memory_space<vmem>>, vector<3x512xf32>
      %cst_18 = arith.constant dense<0.000000e+00> : vector<2x512xf32>
      %17 = tpu.matmul %15, %16, %cst_18 {dimension_numbers = #tpu.dot_dimension_numbers<[1], [0], [0], [1], [0, 0, 1, 1], [], []>} : vector<2x3xf32>, vector<3x512xf32>, vector<2x512xf32> -> vector<2x512xf32>
      %18 = arith.addf %14, %17 : vector<2x512xf32>
      %c0_19 = arith.constant 0 : index
      %c0_20 = arith.constant 0 : index
      %19 = vector.load %arg7[%c0_19, %c0_20] : memref<1x512xf32, #tpu.memory_space<vmem>>, vector<1x512xf32>
      %20 = vector.broadcast %19 : vector<1x512xf32> to vector<2x512xf32>
      %21 = arith.addf %18, %20 : vector<2x512xf32>
      %cst_21 = arith.constant 0.000000e+00 : f32
      %22 = vector.broadcast %cst_21 : f32 to vector<2x512xf32>
      %23 = arith.maximumf %21, %22 : vector<2x512xf32>
      %c0_22 = arith.constant 0 : index
      %c0_23 = arith.constant 0 : index
      %24 = vector.load %arg8[%c0_22, %c0_23] : memref<512x128xf32, #tpu.memory_space<vmem>>, vector<512x128xf32>
      %cst_24 = arith.constant dense<0.000000e+00> : vector<2x128xf32>
      %25 = tpu.matmul %23, %24, %cst_24 {dimension_numbers = #tpu.dot_dimension_numbers<[1], [0], [0], [1], [0, 0, 1, 1], [], []>} : vector<2x512xf32>, vector<512x128xf32>, vector<2x128xf32> -> vector<2x128xf32>
      %c0_25 = arith.constant 0 : index
      %c0_26 = arith.constant 0 : index
      %26 = vector.load %arg9[%c0_25, %c0_26] : memref<1x128xf32, #tpu.memory_space<vmem>>, vector<1x128xf32>
      %27 = vector.broadcast %26 : vector<1x128xf32> to vector<2x128xf32>
      %28 = arith.addf %25, %27 : vector<2x128xf32>
      %29 = arith.negf %28 : vector<2x128xf32>
      %30 = math.exp %29 : vector<2x128xf32>
      %cst_27 = arith.constant 1.000000e+00 : f32
      %31 = vector.broadcast %cst_27 : f32 to vector<2x128xf32>
      %32 = arith.addf %31, %30 : vector<2x128xf32>
      %33 = arith.divf %31, %32 : vector<2x128xf32>
      %c0_28 = arith.constant 0 : index
      %c0_29 = arith.constant 0 : index
      %34 = vector.load %arg10[%c0_28, %c0_29] : memref<2x128xf32, #tpu.memory_space<vmem>>, vector<2x128xf32>
      tpu.vector_store %arg10[%c0_28, %c0_29], %33 {strides = array<i32>} : memref<2x128xf32, #tpu.memory_space<vmem>>, vector<2x128xf32>,
    } else {
    }
    return
  }
  func.func @transform_0(%arg0: i32, %arg1: i32) -> (i32, i32) {
    %c0_i32 = arith.constant 0 : i32
    return %arg0, %arg1 : i32, i32
  }
  func.func @transform_1(%arg0: i32, %arg1: i32) -> (i32, i32) {
    %c0_i32 = arith.constant 0 : i32
    %c0_i32_0 = arith.constant 0 : i32
    return %arg0, %c0_i32 : i32, i32
  }
  func.func @transform_2(%arg0: i32, %arg1: i32) -> (i32, i32) {
    %c0_i32 = arith.constant 0 : i32
    %c0_i32_0 = arith.constant 0 : i32
    return %arg1, %c0_i32 : i32, i32
  }
  func.func @transform_3(%arg0: i32, %arg1: i32) -> (i32, i32) {
    %c0_i32 = arith.constant 0 : i32
    %c0_i32_0 = arith.constant 0 : i32
    %c0_i32_1 = arith.constant 0 : i32
    return %c0_i32, %c0_i32_0 : i32, i32
  }
  func.func @transform_4(%arg0: i32, %arg1: i32) -> (i32, i32) {
    %c0_i32 = arith.constant 0 : i32
    %c0_i32_0 = arith.constant 0 : i32
    %c0_i32_1 = arith.constant 0 : i32
    return %c0_i32, %c0_i32_0 : i32, i32
  }
  func.func @transform_5(%arg0: i32, %arg1: i32) -> (i32, i32) {
    %c0_i32 = arith.constant 0 : i32
    %c0_i32_0 = arith.constant 0 : i32
    %c0_i32_1 = arith.constant 0 : i32
    return %c0_i32, %c0_i32_0 : i32, i32
  }
  func.func @transform_6(%arg0: i32, %arg1: i32) -> (i32, i32) {
    %c0_i32 = arith.constant 0 : i32
    %c0_i32_0 = arith.constant 0 : i32
    %c0_i32_1 = arith.constant 0 : i32
    return %c0_i32, %c0_i32_0 : i32, i32
  }
  func.func @transform_7(%arg0: i32, %arg1: i32) -> (i32, i32) {
    %c0_i32 = arith.constant 0 : i32
    %c0_i32_0 = arith.constant 0 : i32
    %c0_i32_1 = arith.constant 0 : i32
    return %c0_i32, %c0_i32_0 : i32, i32
  }
  func.func @transform_8(%arg0: i32, %arg1: i32) -> (i32, i32) {
    %c0_i32 = arith.constant 0 : i32
    %c0_i32_0 = arith.constant 0 : i32
    return %arg0, %c0_i32 : i32, i32
  }
}

</mosaic_0001>

<bundles_post_ra>
// kernel: tpu_custom_call.1
= control target key start
LH: loop header
LB: loop body
LE: loop exit
PB: predicated region body
PF: predicated region fallthrough
CT: control target
= control target key end

     0   :  { %s3091_s0 = inlined_call_operand.hbm [shape: bf16[2,1024], index: 0, kind: input, shape index: {}]   ;;  %s3092_s1 = inlined_call_operand.hbm [shape: f32[2,3], index: 1, kind: input, shape index: {}]   ;;  %s3093_s2 = inlined_call_operand.hbm [shape: bf16[1024,512], index: 2, kind: input, shape index: {}]   ;;  %s3094_s3 = inlined_call_operand.hbm [shape: f32[512,512], index: 3, kind: input, shape index: {}]   ;;  %s3095_s4 = inlined_call_operand.hbm [shape: f32[3,512], index: 4, kind: input, shape index: {}]   ;;  %s3096_s5 = inlined_call_operand.vmem [shape: f32[1,512], index: 5, kind: input, shape index: {}]   ;;  %s3097_s6 = inlined_call_operand.hbm [shape: f32[512,128], index: 6, kind: input, shape index: {}]   ;;  %s3098_s7 = inlined_call_operand.vmem [shape: f32[1,128], index: 7, kind: input, shape index: {}]   ;;  %s3099_s8 = inlined_call_operand.hbm [shape: f32[2,128], index: 8, kind: output, shape index: {}]  }
   0x1   :  { %3103 = sst [smem:[#allocation21_spill]] %s3091_s0 }
   0x2   :  { %3104 = sst [smem:[#allocation22_spill]] %s3092_s1 }
   0x3   :  { %3105 = sst [smem:[#allocation23_spill]] %s3095_s4 }
   0x4   :  { %13 = vsyncpa [#allocation4], 0 }
   0x5   :  { %15 = vsyncpa [#allocation4 + $0x1], 0 }
   0x6   :  { %16 = vsyncpa [#allocation7], 0 }
   0x7   :  { %17 = vsyncpa [#allocation11], 0 }
   0x8   :  { %18 = vsyncpa [#allocation5], 0  ;;  %s2776_s27 = smov 0   ;;  %s2778_s28 = smov 0  }
   0x9   :  { %s2780_s29 = smov 0   ;;  %s2782_s30 = smov 0  }
   0xa   :  { %s2784_s9 = smov 0   ;;  %s2786_s10 = smov 0  }
   0xb LB: > { %s2807_s11 = sadd.s32 4294967295, %s2712_s10   ;;  %p2065_p0 = scmp.ge.s32.totalorder %s2712_s10, 1  ;;  %s2712_s10 = sphi %s2786_s10, %s24_s10   ;;  %s2708_s9 = sphi %s2784_s9, %s3128_s9   ;;  %s2704_s30 = sphi %s2782_s30, %s3127_s30   ;;  %s2700_s29 = sphi %s2780_s29, %s3126_s29   ;;  %s2696_s28 = sphi %s2778_s28, %s3125_s28   ;;  %s2692_s27 = sphi %s2776_s27, %s3124_s27  }
   0xc   : > { %p3100_p1 = scmp.eq.s32.totalorder %s2807_s11, 0  ;;  %p252_p2 = scmp.lt.s32.totalorder %s2712_s10, 5 }
   0xd   : > { %s2714_s13 = smov [#allocation6]   ;;  %s2715_s15 = smov [#allocation10]  }
   0xe   : > { %p2812_p3 = pnand %p2065_p0, %p252_p2  ;;  %s267_s14 = sshll.u32 %s2714_s13, 4  ;;  %s268_s14 = int_to_ptr.vmem [resolvable:$true] %s267_s14 }
   0xf   : > { %s291_s16 = sshll.u32 %s2715_s15, 4  ;;  %s2469_s18 = scalar_lea.vmem %s268_s14, 32  ;;  %s292_s16 = int_to_ptr.vmem [resolvable:$true] %s291_s16 }
  0x10   : > { %s3106_s12 = scalar_select %p2812_p3, 1, 0 }
  0x11   : > { %p2261_p4 = pneg %p2812_p3  ;;  %p2470_p7 = scmp.ne.s32.totalorder %s268_s14, %s2469_s18 }
  0x12   : > { %p2477_p10 = scmp.lt.s32.totalorder %s268_s14, %s268_s14  ;;  %p2478_p11 = scmp.lt.s32.totalorder %s2469_s18, %s2469_s18 }
  0x13   : > { %p2820_p5 = pnand %p2261_p4, %p3100_p1 }
  0x14   : > { %p2479_p12 = por %p2478_p11, %p2477_p10 }
  0x15   : > { %p2460_p6 = pneg %p2820_p5 }
  0x17   : > { %p2472_p8 = pnand %p2470_p7, %p2460_p6 }
  0x19   : > { %p2473_p9 = pneg %p2472_p8 }
  0x1b   : > { %p2480_p13 = pnand %p2479_p12, %p2473_p9 }
  0x1d   : > { %2483 = shalt.err (!%p2480_p13)
}
  0x1e   : > { %s3108_s1 = sld [smem:[#allocation22_spill]]  ;;  %s2495_s21 = scalar_lea.vmem %s292_s16, 256 }
  0x1f   : > { %p2496_p0 = scmp.ne.s32.totalorder %s292_s16, %s2495_s21  ;;  %p2503_p7 = scmp.lt.s32.totalorder %s292_s16, %s292_s16 }
  0x20   : > { %p2504_p8 = scmp.lt.s32.totalorder %s2495_s21, %s2495_s21 }
  0x21   : > { %p2498_p2 = pnand %p2496_p0, %p2460_p6 }
  0x22   : > { %p2505_p1 = por %p2504_p8, %p2503_p7 }
  0x23   : > { %p2499_p4 = pneg %p2498_p2 }
  0x24   : > { %2264 = dma.hbm_to_vmem [thread:$0]  (!%p2820_p5), %s3108_s1, 32, %s268_s14, [#allocation7]  }
  0x25   : > { %p2506_p3 = pnand %p2505_p1, %p2499_p4 }
  0x27   : > { %2509 = shalt.err (!%p2506_p3)
}
  0x28   : > { %s3109_s4 = sld [smem:[#allocation23_spill]]  ;;  %s33_s24 = sadd.s32 1, %s2708_s9 }
  0x29   : > { %s45_s25 = sadd.s32 1, %s2700_s29  ;;  %p34_p1 = scmp.ge.s32.totalorder %s33_s24, 4 }
  0x2a   : > { %p52_p3 = scmp.ne.s32.totalorder %s2700_s29, %s2696_s28  ;;  %p53_p9 = scmp.eq.s32.totalorder %s2712_s10, 0 }
  0x2b   : > { %p58_p10 = scmp.ne.s32.totalorder %s2696_s28, %s2692_s27  ;;  %s3130_s24 = smov (%p34_p1, %s33_s24), 0 }
  0x2c   : > { %3110 = sst [smem:[#allocation20_spill]] %s3130_s24  ;;  %p2851_p11 = por %p53_p9, %p52_p3 }
  0x2d   : > { %p3112_p12 = scmp.eq.s32.totalorder %s2807_s11, 0  ;;  %s41_s14 = ssub.s32 %s2708_s9, %s3130_s24 }
  0x2e   : > { %2270 = dma.hbm_to_vmem [thread:$0]  (!%p2820_p5), %s3109_s4, 256, %s292_s16, [#allocation11]  }
  0x2f   : > { %p2857_p13 = por %p3112_p12, %p58_p10  ;;  %p2285_p0 = scmp.lt.s32.totalorder %s2712_s10, 4 }
  0x30   : > { %p43_p2 = scmp.eq.s32.totalorder %s41_s14, 0  ;;  %s321_s15 = sand.u32 1, %s2712_s10  }
  0x31   : > { %s323_s16 = sand.u32 1, %s2700_s29   ;;  %s2164_s19 = sshll.u32 %s2708_s9, 5 }
  0x32   : > { %s2867_s18 = scalar_select %p43_p2, %s2700_s29, %s45_s25  }
  0x33   : > { %s2071_s27 = sshll.u32 %s323_s16, 1  ;;  %s3114_s0 = sld [smem:[#allocation21_spill]] }
  0x34   : > { %s325_s23 = scalar_lea.vmem [#allocation3], %s2071_s27  ;;  %p2875_p4 = pnand %p2285_p0, %p2851_p11 }
  0x35   : > { %s335_s1 = sshll.u32 %s325_s23, 4  ;;  %s2074_s14 = sshll.u32 %s323_s16, 9  ;;  %s336_s1 = int_to_ptr.vmem [resolvable:$true] %s335_s1 }
  0x36   : > { %s2879_s24 = scalar_lea.sflag [#allocation4], %s321_s15  ;;  %p2512_p7 = pneg %p2875_p4 }
  0x37   : > { %s2523_s25 = scalar_lea.vmem %s336_s1, 32  ;;  %s2716_s27 = smov [#allocation3]  }
  0x38   : > { %p2524_p8 = scmp.ne.s32.totalorder %s336_s1, %s2523_s25  ;;  %s2528_s26 = sshll.u32 %s2716_s27, 4  ;;  %s2529_s26 = int_to_ptr.vmem [resolvable:$false] %s2528_s26 }
  0x39   : > { %s333_s22 = scalar_lea.hbm %s3114_s0, %s2164_s19  ;;  %s2530_s19 = scalar_lea.vmem %s2529_s26, 64 }
  0x3a   : > { %p2526_p1 = pnand %p2524_p8, %p2512_p7  ;;  %p2531_p9 = scmp.lt.s32.totalorder %s336_s1, %s2529_s26 }
  0x3b   : > { %p2532_p10 = scmp.lt.s32.totalorder %s2530_s19, %s2523_s25 }
  0x3c   : > { %p2527_p3 = pneg %p2526_p1 }
  0x3d   : > { %p2533_p11 = por %p2532_p10, %p2531_p9 }
  0x3f   : > { %p2534_p12 = pnand %p2533_p11, %p2527_p3 }
  0x41   : > { %2537 = shalt.err (!%p2534_p12)
}
  0x42   : > { %2277 = dma.hbm_to_vmem [thread:$0]  (!%p2875_p4), %s333_s22, 32, %s336_s1, %s2879_s24  }
  0x43   : > { %s2166_s15 = sshll.u32 %s2708_s9, 13  ;;  %s346_s16 = scalar_lea.vmem [#allocation8], %s2074_s14 }
  0x44   : > { %s354_s20 = sshll.u32 %s346_s16, 4  ;;  %s2717_s21 = smov [#allocation9]   ;;  %s2890_s20 = int_to_ptr.vmem [resolvable:$true] %s354_s20 }
  0x45   : > { %s277_s23 = sshll.u32 %s2717_s21, 4  ;;  %s278_s23 = int_to_ptr.vmem [resolvable:$true] %s277_s23 }
  0x46   : > { %s2549_s27 = scalar_lea.vmem %s278_s23, 32768  ;;  %p2557_p1 = scmp.lt.s32.totalorder %s278_s23, %s278_s23 }
  0x47   : > { %p2550_p0 = scmp.ne.s32.totalorder %s278_s23, %s2549_s27  ;;  %p2558_p3 = scmp.lt.s32.totalorder %s2549_s27, %s2549_s27 }
  0x49   : > { %p2552_p2 = pnand %p2550_p0, %p2460_p6  ;;  %p2559_p9 = por %p2558_p3, %p2557_p1 }
  0x4b   : > { %p2553_p8 = pneg %p2552_p2 }
  0x4d   : > { %p2560_p10 = pnand %p2559_p9, %p2553_p8 }
  0x4f   : > { %2563 = shalt.err (!%p2560_p10)
}
  0x50   : > { %s2718_s1 = smov 512   ;;  %s2719_s22 = smov 32  }
  0x51   : > { %2267 = dma.hbm_to_vmem [thread:$0]  (!%p2820_p5), %s3094_s3, 32768, %s278_s23, [#allocation7], %s2718_s1, %s2718_s1, %s2719_s22  }
  0x52   : > { %s2720_s26 = smov [#allocation12]   ;;  %s2903_s0 = scalar_lea.hbm %s3093_s2, %s2166_s15 }
  0x53   : > { %s304_s19 = sshll.u32 %s2720_s26, 4  ;;  %s305_s19 = int_to_ptr.vmem [resolvable:$true] %s304_s19 }
  0x54   : > { %s2575_s27 = scalar_lea.vmem %s305_s19, 8192  ;;  %p2583_p2 = scmp.lt.s32.totalorder %s305_s19, %s305_s19 }
  0x55   : > { %p2576_p11 = scmp.ne.s32.totalorder %s305_s19, %s2575_s27  ;;  %p2584_p8 = scmp.lt.s32.totalorder %s2575_s27, %s2575_s27 }
  0x57   : > { %p2578_p12 = pnand %p2576_p11, %p2460_p6  ;;  %p2585_p1 = por %p2584_p8, %p2583_p2 }
  0x59   : > { %p2579_p0 = pneg %p2578_p12 }
  0x5b   : > { %p2586_p3 = pnand %p2585_p1, %p2579_p0 }
  0x5d   : > { %2589 = shalt.err (!%p2586_p3)
}
  0x5e   : > { %s2721_s23 = smov 128   ;;  %s2722_s1 = smov 8  }
  0x5f   : > { %2273 = dma.hbm_to_vmem [thread:$0]  (!%p2820_p5), %s3097_s6, 8192, %s305_s19, [#allocation11], %s2721_s23, %s2721_s23, %s2722_s1  }
  0x60   : > { %s2603_s14 = scalar_lea.vmem %s2890_s20, 8192  ;;  %s2723_s25 = smov [#allocation8]  }
  0x61   : > { %p2604_p6 = scmp.ne.s32.totalorder %s2890_s20, %s2603_s14  ;;  %s2608_s26 = sshll.u32 %s2723_s25, 4  ;;  %s2609_s26 = int_to_ptr.vmem [resolvable:$false] %s2608_s26 }
  0x62   : > { %s2610_s16 = scalar_lea.vmem %s2609_s26, 16384  ;;  %p2611_p11 = scmp.lt.s32.totalorder %s2890_s20, %s2609_s26 }
  0x63   : > { %p2606_p9 = pnand %p2604_p6, %p2512_p7  ;;  %p2612_p12 = scmp.lt.s32.totalorder %s2610_s16, %s2603_s14 }
  0x65   : > { %p2607_p10 = pneg %p2606_p9  ;;  %p2613_p0 = por %p2612_p12, %p2611_p11 }
  0x67   : > { %p2614_p2 = pnand %p2613_p0, %p2607_p10 }
  0x69   : > { %2617 = shalt.err (!%p2614_p2)
}
  0x6a   : > { %s2724_s17 = smov 256   ;;  %s2725_s19 = smov 16  }
  0x6b   : > { %2280 = dma.hbm_to_vmem [thread:$0]  (!%p2875_p4), %s2903_s0, 8192, %s2890_s20, %s2879_s24, %s2724_s17, %s2724_s17, %s2725_s19  }
  0x6c   : > { %p3116_p5 = scmp.ne.s32.totalorder %s3106_s12, 0 }
  0x6d   : > { %s368_s21 = sand.u32 (!%p3116_p5), 1, %s2807_s11   ;;  %s370_s27 = sand.u32 (!%p3116_p5), 1, %s2696_s28  }
  0x6e   : > { %366 = sbr.rel (%p3116_p5) target bundleno = 994 (0x3e2), region = 52  ;;  %s2928_s23 = sshll.u32 (!%p3116_p5), %s370_s27, 1 }
  0x6f   : > { %s369_s1 = scalar_lea.sflag (!%p3116_p5), [#allocation4], %s368_s21  ;;  %s372_s15 = scalar_lea.vmem (!%p3116_p5), [#allocation3], %s2928_s23 }
  0x73   : > { %2667 = dma.done.wait (%p2857_p13), %s369_s1, 32  }
  0x74   : > { %2669 = vsyncadd (%p2857_p13), %s369_s1, 4294967264  ;;  %p3117_p4 = scmp.eq.s32.totalorder %s2807_s11, 0 }
  0x76   : > { %2671 = dma.done.wait (%p3117_p4), [#allocation7], 32   ;;  %p3118_p7 = pmov %p3117_p4 }
  0x77   : > { %s2081_s0 = sshll.u32 %s370_s27, 9 }
  0x78   : > { %2673 = vsyncadd (%p3118_p7), [#allocation7], 4294967264  ;;  %s2939_s4 = scalar_lea.vmem [#allocation8], %s2081_s0 }
  0x79   : > { %2675 = dma.done.wait (%p2857_p13), %s369_s1, 8192  }
  0x7a   : > { %2677 = vsyncadd (%p2857_p13), %s369_s1, 4294959104  ;;  %p3119_p8 = pmov %p3117_p4 }
  0x7b   : > { %p3120_p1 = pmov %p3117_p4 }
  0x7c   : > { %2679 = dma.done.wait (%p3119_p8), [#allocation7], 32768  }
  0x7d   : > { %2681 = vsyncadd (%p3120_p1), [#allocation7], 4294934528  ;;  %p3121_p3 = pmov %p3120_p1 }
  0x7e   : > { %p3122_p6 = pmov %p3120_p1 }
  0x7f   : > { %2683 = dma.done.wait (%p3121_p3), [#allocation11], 8448  }
  0x80   : > { %2685 = vsyncadd (%p3122_p6), [#allocation11], 4294958848  ;;  %p2085_p9 = scmp.ne.s32.totalorder %s2704_s30, 0 }
  0x82   : > { %435 = sbr.rel (%p2085_p9) target bundleno = 137 (0x89), region = 80 }
  0x87   : > { %v2726_v0 = vmov 0.0  }
  0x88   : > { %436 = vst [vmem:[#allocation2] sm:$0xff] %v2726_v0 }
  0x89 PF: > { %v2355_v1 = vld [vmem:[%s2939_s4 + $0xe4] ss:$16 sps:$4 sm:$0xff]   ;;  %v2357_v2 = vld [vmem:[%s2939_s4 + $0xec] ss:$16 sps:$4 sm:$0xff]   ;;  %v2359_v3 = vld [vmem:[%s2939_s4 + $0xe0] ss:$16 sps:$4 sm:$0xff]   ;;  %v515_v41 = vlaneseq }
  0x8a   : > { %848 = vmatprep.subr.bf16.mxu0 %v2355_v1  ;;  %v2360_v4 = vld [vmem:[%s2939_s4 + $0xe8] ss:$16 sps:$4 sm:$0xff]   ;;  %889 = vmatprep.subr.bf16.mxu1 %v2357_v2  ;;  %v2361_v5 = vld [vmem:[%s2939_s4 + $0xc4] ss:$16 sps:$4 sm:$0xff]   ;;  %v2363_v6 = vld [vmem:[%s2939_s4 + $0xcc] ss:$16 sps:$4 sm:$0xff]  }
  0x8b   : > { %849 = vmatpush1.bf16.msra.mxu0 %v2359_v3  ;;  %890 = vmatpush1.bf16.msra.mxu1 %v2360_v4  ;;  %v2365_v7 = vld [vmem:[%s2939_s4 + $0xc0] ss:$16 sps:$4 sm:$0xff]   ;;  %v2366_v8 = vld [vmem:[%s2939_s4 + $0xc8] ss:$16 sps:$4 sm:$0xff]   ;;  %v2367_v9 = vld [vmem:[%s2939_s4 + $0xa4] ss:$16 sps:$4 sm:$0xff]  }
  0x8c   : > { %850 = vmatprep.subr.bf16.mxu0 %v2361_v5  ;;  %891 = vmatprep.subr.bf16.mxu1 %v2363_v6  ;;  %v2369_v10 = vld [vmem:[%s2939_s4 + $0xac] ss:$16 sps:$4 sm:$0xff]   ;;  %v2371_v11 = vld [vmem:[%s2939_s4 + $0xa0] ss:$16 sps:$4 sm:$0xff]   ;;  %v2372_v12 = vld [vmem:[%s2939_s4 + $0xa8] ss:$16 sps:$4 sm:$0xff]  }
  0x8d   : > { %v2373_v13 = vld [vmem:[%s2939_s4 + $0x84] ss:$16 sps:$4 sm:$0xff]   ;;  %v2375_v14 = vld [vmem:[%s2939_s4 + $0x8c] ss:$16 sps:$4 sm:$0xff]   ;;  %v2377_v15 = vld [vmem:[%s2939_s4 + $0x80] ss:$16 sps:$4 sm:$0xff]  }
  0x8e   : > { %v2378_v16 = vld [vmem:[%s2939_s4 + $0x88] ss:$16 sps:$4 sm:$0xff]   ;;  %v2379_v17 = vld [vmem:[%s2939_s4 + $0x64] ss:$16 sps:$4 sm:$0xff]   ;;  %v2381_v18 = vld [vmem:[%s2939_s4 + $0x6c] ss:$16 sps:$4 sm:$0xff]  }
  0x8f   : > { %851 = vmatpush1.bf16.msra.mxu0 %v2365_v7  ;;  %892 = vmatpush1.bf16.msra.mxu1 %v2366_v8  ;;  %v2383_v19 = vld [vmem:[%s2939_s4 + $0x60] ss:$16 sps:$4 sm:$0xff]   ;;  %v2384_v20 = vld [vmem:[%s2939_s4 + $0x68] ss:$16 sps:$4 sm:$0xff]   ;;  %v2385_v21 = vld [vmem:[%s2939_s4 + $0x44] ss:$16 sps:$4 sm:$0xff]  }
  0x90   : > { %852 = vmatprep.subr.bf16.mxu0 %v2367_v9  ;;  %893 = vmatprep.subr.bf16.mxu1 %v2369_v10  ;;  %v2387_v22 = vld [vmem:[%s2939_s4 + $0x4c] ss:$16 sps:$4 sm:$0xff]   ;;  %v2389_v23 = vld [vmem:[%s2939_s4 + $0x40] ss:$16 sps:$4 sm:$0xff]   ;;  %v2390_v24 = vld [vmem:[%s2939_s4 + $0x48] ss:$16 sps:$4 sm:$0xff]  }
  0x91   : > { %v2391_v25 = vld [vmem:[%s2939_s4 + $0x24] ss:$16 sps:$4 sm:$0xff]   ;;  %v2393_v26 = vld [vmem:[%s2939_s4 + $0x2c] ss:$16 sps:$4 sm:$0xff]   ;;  %v2395_v27 = vld [vmem:[%s2939_s4 + $0x20] ss:$16 sps:$4 sm:$0xff]  }
  0x92   : > { %v2396_v28 = vld [vmem:[%s2939_s4 + $0x28] ss:$16 sps:$4 sm:$0xff]   ;;  %v2397_v29 = vld [vmem:[%s2939_s4 + $0x4] ss:$16 sps:$4 sm:$0xff]   ;;  %v2399_v30 = vld [vmem:[%s2939_s4 + $0xc] ss:$16 sps:$4 sm:$0xff]  }
  0x93   : > { %853 = vmatpush1.bf16.msra.mxu0 %v2371_v11  ;;  %894 = vmatpush1.bf16.msra.mxu1 %v2372_v12  ;;  %v2401_v31 = vld [vmem:[%s2939_s4] ss:$16 sps:$4 sm:$0xff]   ;;  %v2402_v32 = vld [vmem:[%s2939_s4 + $0x8] ss:$16 sps:$4 sm:$0xff]   ;;  %v2403_v33 = vld [vmem:[%s2939_s4 + $0x1e4] ss:$16 sps:$4 sm:$0xff]  }
  0x94   : > { %854 = vmatprep.subr.bf16.mxu0 %v2373_v13  ;;  %895 = vmatprep.subr.bf16.mxu1 %v2375_v14  ;;  %v2405_v34 = vld [vmem:[%s2939_s4 + $0x1ec] ss:$16 sps:$4 sm:$0xff]   ;;  %v2407_v35 = vld [vmem:[%s2939_s4 + $0x1e0] ss:$16 sps:$4 sm:$0xff]   ;;  %v2408_v36 = vld [vmem:[%s2939_s4 + $0x1e8] ss:$16 sps:$4 sm:$0xff]  }
  0x95   : > { %v2409_v37 = vld [vmem:[%s2939_s4 + $0x1c4] ss:$16 sps:$4 sm:$0xff]   ;;  %v2411_v38 = vld [vmem:[%s2939_s4 + $0x1cc] ss:$16 sps:$4 sm:$0xff]   ;;  %v2727_v39 = vmov 1966171168  }
  0x96   : > { %v513_v40 = vunpack.c.l.s4 %v2727_v39  ;;  %v2413_v42 = vld [vmem:[%s2939_s4 + $0x1c0] ss:$16 sps:$4 sm:$0xff]   ;;  %v2414_v43 = vld [vmem:[%s2939_s4 + $0x1c8] ss:$16 sps:$4 sm:$0xff]   ;;  %v2415_v44 = vld [vmem:[%s2939_s4 + $0x1a4] ss:$16 sps:$4 sm:$0xff]  }
  0x97   : > { %855 = vmatpush1.bf16.msra.mxu0 %v2377_v15  ;;  %896 = vmatpush1.bf16.msra.mxu1 %v2378_v16  ;;  %v2417_v45 = vld [vmem:[%s2939_s4 + $0x1ac] ss:$16 sps:$4 sm:$0xff]   ;;  %v2996_v47 = vshrl.u32 %v515_v41, 7  ;;  %v2419_v48 = vld [vmem:[%s2939_s4 + $0x1a0] ss:$16 sps:$4 sm:$0xff]   ;;  %p2151_p13 = scmp.ne.s32.totalorder %s2704_s30, 3 }
  0x98   : > { %856 = vmatprep.subr.bf16.mxu0 %v2379_v17  ;;  %897 = vmatprep.subr.bf16.mxu1 %v2381_v18  ;;  %v514_v46 = vunpack.c.0.s8 %v513_v40  ;;  %v2420_v49 = vld [vmem:[%s2939_s4 + $0x1a8] ss:$16 sps:$4 sm:$0xff]   ;;  %v2421_v50 = vld [vmem:[%s2939_s4 + $0x184] ss:$16 sps:$4 sm:$0xff]   ;;  %v2423_v51 = vld [vmem:[%s2939_s4 + $0x18c] ss:$16 sps:$4 sm:$0xff]  }
  0x99   : > { %v2086_v53 = vld.sshfl [vmem:[%s372_s15] sm:$0x11 pattern:$0x75316420]  ;;  %v2425_v54 = vld [vmem:[%s2939_s4 + $0x180] ss:$16 sps:$4 sm:$0xff]  }
  0x9a   : > { %v517_v52 = vsub.s32 %v514_v46, %v2996_v47  ;;  %v2426_v55 = vld [vmem:[%s2939_s4 + $0x188] ss:$16 sps:$4 sm:$0xff]   ;;  %v511_v56 = vcombine.high %v2086_v53, %v2086_v53  ;;  %v2427_v57 = vld [vmem:[%s2939_s4 + $0x164] ss:$16 sps:$4 sm:$0xff]   ;;  %v2429_v58 = vld [vmem:[%s2939_s4 + $0x16c] ss:$16 sps:$4 sm:$0xff]  }
  0x9b   : > { %857 = vmatpush1.bf16.msra.mxu0 %v2383_v19  ;;  %898 = vmatpush1.bf16.msra.mxu1 %v2384_v20  ;;  %v2431_v60 = vld [vmem:[%s2939_s4 + $0x160] ss:$16 sps:$4 sm:$0xff]   ;;  %v2432_v61 = vld [vmem:[%s2939_s4 + $0x168] ss:$16 sps:$4 sm:$0xff]   ;;  %v2433_v62 = vld [vmem:[%s2939_s4 + $0x144] ss:$16 sps:$4 sm:$0xff]  }
  0x9c   : > { %858 = vmatprep.subr.bf16.mxu0 %v2385_v21  ;;  %899 = vmatprep.subr.bf16.mxu1 %v2387_v22  ;;  %v525_v59 = vrot.slane %v511_v56, %v517_v52  ;;  %v2435_v63 = vld [vmem:[%s2939_s4 + $0x14c] ss:$16 sps:$4 sm:$0xff]   ;;  %v2437_v0 = vld [vmem:[%s2939_s4 + $0x140] ss:$16 sps:$4 sm:$0xff]   ;;  %v2438_v1 = vld [vmem:[%s2939_s4 + $0x148] ss:$16 sps:$4 sm:$0xff]   ;;  %v518_v10 = vrot.slane %v2086_v53, %v517_v52 }
  0x9d   : > { %v2439_v2 = vld [vmem:[%s2939_s4 + $0x124] ss:$16 sps:$4 sm:$0xff]   ;;  %v2441_v3 = vld [vmem:[%s2939_s4 + $0x12c] ss:$16 sps:$4 sm:$0xff]   ;;  %v2443_v4 = vld [vmem:[%s2939_s4 + $0x120] ss:$16 sps:$4 sm:$0xff]  }
  0x9e   : > { %880 = vmatprep.mubr.bf16.mxu0 %v525_v59  ;;  %921 = vmatprep.mubr.bf16.mxu1 %v525_v59  ;;  %v2444_v5 = vld [vmem:[%s2939_s4 + $0x128] ss:$16 sps:$4 sm:$0xff]   ;;  %v2445_v6 = vld [vmem:[%s2939_s4 + $0x104] ss:$16 sps:$4 sm:$0xff]   ;;  %v2447_v7 = vld [vmem:[%s2939_s4 + $0x10c] ss:$16 sps:$4 sm:$0xff]  }
  0x9f   : > { %859 = vmatpush1.bf16.msra.mxu0 %v2389_v23  ;;  %900 = vmatpush1.bf16.msra.mxu1 %v2390_v24  ;;  %v2449_v8 = vld [vmem:[%s2939_s4 + $0x100] ss:$16 sps:$4 sm:$0xff]   ;;  %v2450_v9 = vld [vmem:[%s2939_s4 + $0x108] ss:$16 sps:$4 sm:$0xff]   ;;  %v2728_v11 = vmov 1983009808  }
  0xa0   : > { %860 = vmatprep.subr.bf16.mxu0 %v2391_v25  ;;  %901 = vmatprep.subr.bf16.mxu1 %v2393_v26  ;;  %v937_v12 = vunpack.c.l.s4 %v2728_v11  ;;  %v437_v25 = vld [vmem:[#allocation2] sm:$0xff] }
  0xa2   : > { %v938_v13 = vunpack.c.0.s8 %v937_v12 }
  0xa3   : > { %861 = vmatpush1.bf16.msra.mxu0 %v2395_v27  ;;  %902 = vmatpush1.bf16.msra.mxu1 %v2396_v28 }
  0xa4   : > { %862 = vmatprep.subr.bf16.mxu0 %v2397_v29  ;;  %903 = vmatprep.subr.bf16.mxu1 %v2399_v30  ;;  %v3024_v16 = vsub.s32 %v938_v13, %v2996_v47 }
  0xa7   : > { %863 = vmatpush1.bf16.msra.mxu0 %v2401_v31  ;;  %904 = vmatpush1.bf16.msra.mxu1 %v2402_v32 }
  0xa8   : > { %864 = vmatprep.subr.bf16.mxu0 %v2403_v33  ;;  %905 = vmatprep.subr.bf16.mxu1 %v2405_v34 }
  0xab   : > { %865 = vmatpush2.bf16.msra.mxu0 %v2407_v35  ;;  %906 = vmatpush2.bf16.msra.mxu1 %v2408_v36 }
  0xac   : > { %866 = vmatprep.subr.bf16.mxu0 %v2409_v37  ;;  %907 = vmatprep.subr.bf16.mxu1 %v2411_v38 }
  0xaf   : > { %867 = vmatpush2.bf16.msra.mxu0 %v2413_v42  ;;  %908 = vmatpush2.bf16.msra.mxu1 %v2414_v43 }
  0xb0   : > { %868 = vmatprep.subr.bf16.mxu0 %v2415_v44  ;;  %909 = vmatprep.subr.bf16.mxu1 %v2417_v45 }
  0xb3   : > { %869 = vmatpush2.bf16.msra.mxu0 %v2419_v48  ;;  %910 = vmatpush2.bf16.msra.mxu1 %v2420_v49 }
  0xb4   : > { %870 = vmatprep.subr.bf16.mxu0 %v2421_v50  ;;  %911 = vmatprep.subr.bf16.mxu1 %v2423_v51 }
  0xb7   : > { %871 = vmatpush2.bf16.msra.mxu0 %v2425_v54  ;;  %912 = vmatpush2.bf16.msra.mxu1 %v2426_v55 }
  0xb8   : > { %872 = vmatprep.subr.bf16.mxu0 %v2427_v57  ;;  %913 = vmatprep.subr.bf16.mxu1 %v2429_v58 }
  0xbb   : > { %873 = vmatpush2.bf16.msra.mxu0 %v2431_v60  ;;  %914 = vmatpush2.bf16.msra.mxu1 %v2432_v61 }
  0xbc   : > { %874 = vmatprep.subr.bf16.mxu0 %v2433_v62  ;;  %915 = vmatprep.subr.bf16.mxu1 %v2435_v63 }
  0xbf   : > { %875 = vmatpush2.bf16.msra.mxu0 %v2437_v0  ;;  %916 = vmatpush2.bf16.msra.mxu1 %v2438_v1 }
  0xc0   : > { %876 = vmatprep.subr.bf16.mxu0 %v2439_v2  ;;  %917 = vmatprep.subr.bf16.mxu1 %v2441_v3 }
  0xc3   : > { %877 = vmatpush2.bf16.msra.mxu0 %v2443_v4  ;;  %918 = vmatpush2.bf16.msra.mxu1 %v2444_v5 }
  0xc4   : > { %878 = vmatprep.subr.bf16.mxu0 %v2445_v6  ;;  %919 = vmatprep.subr.bf16.mxu1 %v2447_v7 }
  0xc7   : > { %879 = vmatpush2.bf16.msra.mxu0 %v2449_v8  ;;  %920 = vmatpush2.bf16.msra.mxu1 %v2450_v9 }
  0xca   : > { %881 = vmatmul.mubr.bf16.vlgmr.msra.gmra.mxu0 %v518_v10  ;;  %922 = vmatmul.mubr.bf16.vlgmr.msra.gmra.mxu1 %v518_v10 }
 0x18a   : > { %v882_v14 = vpop.f32.mrf.mxu0  ;;  %v923_v15 = vpop.f32.mrf.mxu1 }
 0x18c   : > { %v884_v17 = vpop.f32.mrf.mxu0  ;;  %v925_v18 = vpop.f32.mrf.mxu1 }
 0x18d   : > { %v934_v19 = vcombine.low %v882_v14, %v884_v17  ;;  %v935_v20 = vcombine.low %v923_v15, %v925_v18 }
 0x18e   : > { %v886_v21 = vpop.f32.mrf.mxu0  ;;  %v927_v22 = vpop.f32.mrf.mxu1 }
 0x18f   : > { %v942_v23 = vrot.slane %v934_v19, %v3024_v16  ;;  %v949_v24 = vrot.slane %v935_v20, %v3024_v16 }
 0x190   : > { %v887_v26 = vpop.f32.mrf.mxu0  ;;  %v928_v27 = vpop.f32.mrf.mxu1 }
 0x191   : > { %v950_v28 = vcombine.low %v942_v23, %v949_v24  ;;  %957 = sbr.rel (%p2151_p13) target bundleno = 979 (0x3d3), region = 84 }
 0x193   : > { %v952_v29 = vadd.f32 %v950_v28, %v437_v25 }
 0x195   : > { %953 = vst [vmem:[#allocation2] sm:$0xff] %v952_v29 }
 0x196   : > { %v1216_v30 = vld [vmem:[#allocation10] sm:$0x77]  ;;  %vm1226_vm0 = vcmask 1042432   ;;  %v1217_v31 = vld [vmem:[#allocation10 + $0x8] sm:$0x77]  ;;  %v2729_v34 = vmov 0.0  }
 0x197   : > { %v1220_v32 = vcombine.high %v1216_v30, %v1216_v30  ;;  %v1221_v33 = vcombine.high %v1217_v31, %v1217_v31  ;;  %1299 = vmatprep.mubr.f32.mxu0 %v2729_v34  ;;  %1370 = vmatprep.mubr.f32.mxu1 %v2729_v34  ;;  %v1215_v35 = vld [vmem:[#allocation6] sm:$0x3]  ;;  %vm1222_vm1 = vcmask 23552   ;;  %v1020_v36 = vld [vmem:[#allocation9 + $0x1e8] sm:$0xff]  ;;  %v1019_v38 = vld [vmem:[#allocation9 + $0x1e0] sm:$0xff] }
 0x198   : > { %v1148_v37 = vld [vmem:[#allocation9 + $0x5e8] sm:$0xff]  ;;  %v1147_v39 = vld [vmem:[#allocation9 + $0x5e0] sm:$0xff] }
 0x199   : > { %2152 = vmatprep.subr.msk.mxu0 %vm1226_vm0, %v1220_v32  ;;  %2155 = vmatprep.subr.msk.mxu1 %vm1226_vm0, %v1221_v33  ;;  %v1016_v40 = vld [vmem:[#allocation9 + $0x1c8] sm:$0xff]  ;;  %v1015_v42 = vld [vmem:[#allocation9 + $0x1c0] sm:$0xff] }
 0x19a   : > { %2153 = vmatpush1.msk.msra.mxu0 %vm1226_vm0, %v1216_v30  ;;  %2156 = vmatpush1.msk.msra.mxu1 %vm1226_vm0, %v1217_v31  ;;  %v1144_v41 = vld [vmem:[#allocation9 + $0x5c8] sm:$0xff]  ;;  %v1143_v43 = vld [vmem:[#allocation9 + $0x5c0] sm:$0xff] }
 0x19b   : > { %2154 = vmatmul.mubr.msk.f32.vlgmr.msra.gmra.mxu0 %vm1222_vm1, %v1215_v35  ;;  %1399 = vmatprep.subr.mxu0 %v1020_v36  ;;  %v1012_v44 = vld [vmem:[#allocation9 + $0x1a8] sm:$0xff]  ;;  %v1011_v46 = vld [vmem:[#allocation9 + $0x1a0] sm:$0xff] }
 0x19c   : > { %1470 = vmatprep.subr.mxu1 %v1148_v37  ;;  %2157 = vmatmul.mubr.msk.f32.vlgmr.msra.gmra.mxu1 %vm1222_vm1, %v1215_v35  ;;  %v1140_v45 = vld [vmem:[#allocation9 + $0x5a8] sm:$0xff]  ;;  %v1139_v48 = vld [vmem:[#allocation9 + $0x5a0] sm:$0xff] }
 0x19d   : > { %1400 = vmatpush1.msra.mxu0 %v1019_v38  ;;  %1471 = vmatpush1.msra.mxu1 %v1147_v39  ;;  %v1008_v49 = vld [vmem:[#allocation9 + $0x188] sm:$0xff]  ;;  %v1007_v51 = vld [vmem:[#allocation9 + $0x180] sm:$0xff] }
 0x19e   : > { %1401 = vmatprep.subr.mxu0 %v1016_v40  ;;  %1472 = vmatprep.subr.mxu1 %v1144_v41  ;;  %v1136_v50 = vld [vmem:[#allocation9 + $0x588] sm:$0xff]  ;;  %v1135_v52 = vld [vmem:[#allocation9 + $0x580] sm:$0xff] }
 0x19f   : > { %1402 = vmatpush1.msra.mxu0 %v1015_v42  ;;  %1473 = vmatpush1.msra.mxu1 %v1143_v43  ;;  %v1004_v53 = vld [vmem:[#allocation9 + $0x168] sm:$0xff]  ;;  %v1003_v55 = vld [vmem:[#allocation9 + $0x160] sm:$0xff] }
 0x1a0   : > { %1403 = vmatprep.subr.mxu0 %v1012_v44  ;;  %1474 = vmatprep.subr.mxu1 %v1140_v45  ;;  %v1132_v54 = vld [vmem:[#allocation9 + $0x568] sm:$0xff]  ;;  %v1131_v56 = vld [vmem:[#allocation9 + $0x560] sm:$0xff] }
 0x1a1   : > { %1404 = vmatpush1.msra.mxu0 %v1011_v46  ;;  %1475 = vmatpush1.msra.mxu1 %v1139_v48  ;;  %v1000_v57 = vld [vmem:[#allocation9 + $0x148] sm:$0xff]  ;;  %v999_v59 = vld [vmem:[#allocation9 + $0x140] sm:$0xff] }
 0x1a2   : > { %1405 = vmatprep.subr.mxu0 %v1008_v49  ;;  %1476 = vmatprep.subr.mxu1 %v1136_v50  ;;  %v1128_v58 = vld [vmem:[#allocation9 + $0x548] sm:$0xff]  ;;  %v1127_v60 = vld [vmem:[#allocation9 + $0x540] sm:$0xff] }
 0x1a3   : > { %1406 = vmatpush1.msra.mxu0 %v1007_v51  ;;  %1477 = vmatpush1.msra.mxu1 %v1135_v52  ;;  %v996_v61 = vld [vmem:[#allocation9 + $0x128] sm:$0xff]  ;;  %v995_v63 = vld [vmem:[#allocation9 + $0x120] sm:$0xff] }
 0x1a4   : > { %1407 = vmatprep.subr.mxu0 %v1004_v53  ;;  %1478 = vmatprep.subr.mxu1 %v1132_v54  ;;  %v1124_v62 = vld [vmem:[#allocation9 + $0x528] sm:$0xff]  ;;  %v1123_v0 = vld [vmem:[#allocation9 + $0x520] sm:$0xff] }
 0x1a5   : > { %1408 = vmatpush1.msra.mxu0 %v1003_v55  ;;  %1479 = vmatpush1.msra.mxu1 %v1131_v56  ;;  %v992_v1 = vld [vmem:[#allocation9 + $0x108] sm:$0xff]  ;;  %v991_v3 = vld [vmem:[#allocation9 + $0x100] sm:$0xff] }
 0x1a6   : > { %1409 = vmatprep.subr.mxu0 %v1000_v57  ;;  %1480 = vmatprep.subr.mxu1 %v1128_v58  ;;  %v1120_v2 = vld [vmem:[#allocation9 + $0x508] sm:$0xff]  ;;  %v1119_v4 = vld [vmem:[#allocation9 + $0x500] sm:$0xff] }
 0x1a7   : > { %1410 = vmatpush1.msra.mxu0 %v999_v59  ;;  %1481 = vmatpush1.msra.mxu1 %v1127_v60  ;;  %v988_v5 = vld [vmem:[#allocation9 + $0xe8] sm:$0xff]  ;;  %v987_v7 = vld [vmem:[#allocation9 + $0xe0] sm:$0xff] }
 0x1a8   : > { %1411 = vmatprep.subr.mxu0 %v996_v61  ;;  %1482 = vmatprep.subr.mxu1 %v1124_v62  ;;  %v1116_v6 = vld [vmem:[#allocation9 + $0x4e8] sm:$0xff]  ;;  %v1115_v8 = vld [vmem:[#allocation9 + $0x4e0] sm:$0xff] }
 0x1a9   : > { %1412 = vmatpush1.msra.mxu0 %v995_v63  ;;  %1483 = vmatpush1.msra.mxu1 %v1123_v0  ;;  %v984_v9 = vld [vmem:[#allocation9 + $0xc8] sm:$0xff]  ;;  %v983_v11 = vld [vmem:[#allocation9 + $0xc0] sm:$0xff] }
 0x1aa   : > { %1413 = vmatprep.subr.mxu0 %v992_v1  ;;  %1484 = vmatprep.subr.mxu1 %v1120_v2  ;;  %v1112_v10 = vld [vmem:[#allocation9 + $0x4c8] sm:$0xff]  ;;  %v1111_v12 = vld [vmem:[#allocation9 + $0x4c0] sm:$0xff] }
 0x1ab   : > { %1414 = vmatpush1.msra.mxu0 %v991_v3  ;;  %1485 = vmatpush1.msra.mxu1 %v1119_v4  ;;  %v980_v13 = vld [vmem:[#allocation9 + $0xa8] sm:$0xff]  ;;  %v979_v15 = vld [vmem:[#allocation9 + $0xa0] sm:$0xff] }
 0x1ac   : > { %1415 = vmatprep.subr.mxu0 %v988_v5  ;;  %1486 = vmatprep.subr.mxu1 %v1116_v6  ;;  %v1108_v14 = vld [vmem:[#allocation9 + $0x4a8] sm:$0xff]  ;;  %v1107_v17 = vld [vmem:[#allocation9 + $0x4a0] sm:$0xff] }
 0x1ad   : > { %1416 = vmatpush1.msra.mxu0 %v987_v7  ;;  %1487 = vmatpush1.msra.mxu1 %v1115_v8  ;;  %v976_v18 = vld [vmem:[#allocation9 + $0x88] sm:$0xff]  ;;  %v975_v20 = vld [vmem:[#allocation9 + $0x80] sm:$0xff] }
 0x1ae   : > { %1417 = vmatprep.subr.mxu0 %v984_v9  ;;  %1488 = vmatprep.subr.mxu1 %v1112_v10  ;;  %v1104_v19 = vld [vmem:[#allocation9 + $0x488] sm:$0xff]  ;;  %v1103_v21 = vld [vmem:[#allocation9 + $0x480] sm:$0xff] }
 0x1af   : > { %1418 = vmatpush1.msra.mxu0 %v983_v11  ;;  %1489 = vmatpush1.msra.mxu1 %v1111_v12  ;;  %v972_v22 = vld [vmem:[#allocation9 + $0x68] sm:$0xff]  ;;  %v971_v24 = vld [vmem:[#allocation9 + $0x60] sm:$0xff] }
 0x1b0   : > { %1419 = vmatprep.subr.mxu0 %v980_v13  ;;  %1490 = vmatprep.subr.mxu1 %v1108_v14  ;;  %v1100_v23 = vld [vmem:[#allocation9 + $0x468] sm:$0xff]  ;;  %v1099_v25 = vld [vmem:[#allocation9 + $0x460] sm:$0xff] }
 0x1b1   : > { %1420 = vmatpush1.msra.mxu0 %v979_v15  ;;  %1491 = vmatpush1.msra.mxu1 %v1107_v17  ;;  %v968_v26 = vld [vmem:[#allocation9 + $0x48] sm:$0xff]  ;;  %v967_v28 = vld [vmem:[#allocation9 + $0x40] sm:$0xff] }
 0x1b2   : > { %1421 = vmatprep.subr.mxu0 %v976_v18  ;;  %1492 = vmatprep.subr.mxu1 %v1104_v19  ;;  %v1096_v27 = vld [vmem:[#allocation9 + $0x448] sm:$0xff]  ;;  %v1095_v29 = vld [vmem:[#allocation9 + $0x440] sm:$0xff] }
 0x1b3   : > { %1422 = vmatpush1.msra.mxu0 %v975_v20  ;;  %1493 = vmatpush1.msra.mxu1 %v1103_v21  ;;  %v964_v30 = vld [vmem:[#allocation9 + $0x28] sm:$0xff]  ;;  %v963_v32 = vld [vmem:[#allocation9 + $0x20] sm:$0xff]  ;;  %v958_v20 = vld [vmem:[#allocation2] sm:$0xff] }
 0x1b4   : > { %1423 = vmatprep.subr.mxu0 %v972_v22  ;;  %1494 = vmatprep.subr.mxu1 %v1100_v23  ;;  %v1092_v31 = vld [vmem:[#allocation9 + $0x428] sm:$0xff]  ;;  %v1091_v33 = vld [vmem:[#allocation9 + $0x420] sm:$0xff] }
 0x1b5   : > { %1424 = vmatpush1.msra.mxu0 %v971_v24  ;;  %1495 = vmatpush1.msra.mxu1 %v1099_v25  ;;  %v960_v34 = vld [vmem:[#allocation9 + $0x8] sm:$0xff]  ;;  %v959_v36 = vld [vmem:[#allocation9] sm:$0xff] }
 0x1b6   : > { %1425 = vmatprep.subr.mxu0 %v968_v26  ;;  %1496 = vmatprep.subr.mxu1 %v1096_v27  ;;  %v1088_v35 = vld [vmem:[#allocation9 + $0x408] sm:$0xff]  ;;  %v1087_v37 = vld [vmem:[#allocation9 + $0x400] sm:$0xff]  ;;  %v1378_v27 = vcombine.high %v958_v20, %v958_v20 }
 0x1b7   : > { %1426 = vmatpush1.msra.mxu0 %v967_v28  ;;  %1497 = vmatpush1.msra.mxu1 %v1095_v29  ;;  %v1084_v38 = vld [vmem:[#allocation9 + $0x3e8] sm:$0xff]  ;;  %v1083_v40 = vld [vmem:[#allocation9 + $0x3e0] sm:$0xff] }
 0x1b8   : > { %1427 = vmatprep.subr.mxu0 %v964_v30  ;;  %1498 = vmatprep.subr.mxu1 %v1092_v31  ;;  %v1212_v39 = vld [vmem:[#allocation9 + $0x7e8] sm:$0xff]  ;;  %v1211_v41 = vld [vmem:[#allocation9 + $0x7e0] sm:$0xff] }
 0x1b9   : > { %1428 = vmatpush1.msra.mxu0 %v963_v32  ;;  %1499 = vmatpush1.msra.mxu1 %v1091_v33  ;;  %v1080_v42 = vld [vmem:[#allocation9 + $0x3c8] sm:$0xff]  ;;  %v1079_v44 = vld [vmem:[#allocation9 + $0x3c0] sm:$0xff]  ;;  %v3030_v32 = vrot.slane %v958_v20, %v3024_v16  ;;  %v1114_v20 = vld [vmem:[#allocation9 + $0x4d8] sm:$0xff] }
 0x1ba   : > { %1429 = vmatprep.subr.mxu0 %v960_v34  ;;  %1500 = vmatprep.subr.mxu1 %v1088_v35  ;;  %v1208_v43 = vld [vmem:[#allocation9 + $0x7c8] sm:$0xff]  ;;  %v1207_v45 = vld [vmem:[#allocation9 + $0x7c0] sm:$0xff] }
 0x1bb   : > { %1430 = vmatpush1.msra.mxu0 %v959_v36  ;;  %1501 = vmatpush1.msra.mxu1 %v1087_v37  ;;  %v1076_v46 = vld [vmem:[#allocation9 + $0x3a8] sm:$0xff]  ;;  %v1075_v49 = vld [vmem:[#allocation9 + $0x3a0] sm:$0xff]  ;;  %v3033_v37 = vrot.slane %v1378_v27, %v3024_v16  ;;  %v978_v27 = vld [vmem:[#allocation9 + $0x98] sm:$0xff] }
 0x1bc   : > { %1431 = vmatprep.subr.mxu0 %v1084_v38  ;;  %1502 = vmatprep.subr.mxu1 %v1212_v39  ;;  %v1204_v48 = vld [vmem:[#allocation9 + $0x7a8] sm:$0xff]  ;;  %v1203_v50 = vld [vmem:[#allocation9 + $0x7a0] sm:$0xff] }
 0x1bd   : > { %1432 = vmatpush2.msra.mxu0 %v1083_v40  ;;  %1503 = vmatpush2.msra.mxu1 %v1211_v41  ;;  %v1072_v51 = vld [vmem:[#allocation9 + $0x388] sm:$0xff]  ;;  %v1071_v53 = vld [vmem:[#allocation9 + $0x380] sm:$0xff]  ;;  %v3041_v16 = vcombine.high %v3033_v37, %v3033_v37 }
 0x1be   : > { %1433 = vmatprep.subr.mxu0 %v1080_v42  ;;  %1504 = vmatprep.subr.mxu1 %v1208_v43  ;;  %v1200_v52 = vld [vmem:[#allocation9 + $0x788] sm:$0xff]  ;;  %v1199_v54 = vld [vmem:[#allocation9 + $0x780] sm:$0xff]  ;;  %v3037_v42 = vcombine.high %v3030_v32, %v3030_v32 }
 0x1bf   : > { %1434 = vmatpush2.msra.mxu0 %v1079_v44  ;;  %1505 = vmatpush2.msra.mxu1 %v1207_v45  ;;  %v1068_v55 = vld [vmem:[#allocation9 + $0x368] sm:$0xff]  ;;  %v1067_v57 = vld [vmem:[#allocation9 + $0x360] sm:$0xff]  ;;  %v1022_v45 = vld [vmem:[#allocation9 + $0x1f8] sm:$0xff] }
 0x1c0   : > { %1435 = vmatprep.subr.mxu0 %v1076_v46  ;;  %1506 = vmatprep.subr.mxu1 %v1204_v48  ;;  %v1196_v56 = vld [vmem:[#allocation9 + $0x768] sm:$0xff]  ;;  %v1195_v58 = vld [vmem:[#allocation9 + $0x760] sm:$0xff]  ;;  %v1150_v46 = vld [vmem:[#allocation9 + $0x5f8] sm:$0xff] }
 0x1c1   : > { %1436 = vmatpush2.msra.mxu0 %v1075_v49  ;;  %1507 = vmatpush2.msra.mxu1 %v1203_v50  ;;  %v1064_v59 = vld [vmem:[#allocation9 + $0x348] sm:$0xff]  ;;  %v1063_v61 = vld [vmem:[#allocation9 + $0x340] sm:$0xff]  ;;  %v1021_v48 = vld [vmem:[#allocation9 + $0x1f0] sm:$0xff] }
 0x1c2   : > { %1437 = vmatprep.subr.mxu0 %v1072_v51  ;;  %1508 = vmatprep.subr.mxu1 %v1200_v52  ;;  %v1192_v60 = vld [vmem:[#allocation9 + $0x748] sm:$0xff]  ;;  %v1191_v62 = vld [vmem:[#allocation9 + $0x740] sm:$0xff]  ;;  %v1149_v49 = vld [vmem:[#allocation9 + $0x5f0] sm:$0xff] }
 0x1c3   : > { %1438 = vmatpush2.msra.mxu0 %v1071_v53  ;;  %1509 = vmatpush2.msra.mxu1 %v1199_v54  ;;  %v1060_v63 = vld [vmem:[#allocation9 + $0x328] sm:$0xff]  ;;  %v1059_v1 = vld [vmem:[#allocation9 + $0x320] sm:$0xff]  ;;  %v1018_v50 = vld [vmem:[#allocation9 + $0x1d8] sm:$0xff] }
 0x1c4   : > { %1439 = vmatprep.subr.mxu0 %v1068_v55  ;;  %1510 = vmatprep.subr.mxu1 %v1196_v56  ;;  %v1188_v0 = vld [vmem:[#allocation9 + $0x728] sm:$0xff]  ;;  %v1187_v2 = vld [vmem:[#allocation9 + $0x720] sm:$0xff]  ;;  %v1146_v51 = vld [vmem:[#allocation9 + $0x5d8] sm:$0xff] }
 0x1c5   : > { %1440 = vmatpush2.msra.mxu0 %v1067_v57  ;;  %1511 = vmatpush2.msra.mxu1 %v1195_v58  ;;  %v1056_v3 = vld [vmem:[#allocation9 + $0x308] sm:$0xff]  ;;  %v1055_v5 = vld [vmem:[#allocation9 + $0x300] sm:$0xff]  ;;  %v1017_v52 = vld [vmem:[#allocation9 + $0x1d0] sm:$0xff] }
 0x1c6   : > { %1441 = vmatprep.subr.mxu0 %v1064_v59  ;;  %1512 = vmatprep.subr.mxu1 %v1192_v60  ;;  %v1184_v4 = vld [vmem:[#allocation9 + $0x708] sm:$0xff]  ;;  %v1183_v6 = vld [vmem:[#allocation9 + $0x700] sm:$0xff]  ;;  %v1145_v53 = vld [vmem:[#allocation9 + $0x5d0] sm:$0xff] }
 0x1c7   : > { %1442 = vmatpush2.msra.mxu0 %v1063_v61  ;;  %1513 = vmatpush2.msra.mxu1 %v1191_v62  ;;  %v1052_v7 = vld [vmem:[#allocation9 + $0x2e8] sm:$0xff]  ;;  %v1051_v9 = vld [vmem:[#allocation9 + $0x2e0] sm:$0xff]  ;;  %v1014_v54 = vld [vmem:[#allocation9 + $0x1b8] sm:$0xff] }
 0x1c8   : > { %1443 = vmatprep.subr.mxu0 %v1060_v63  ;;  %1514 = vmatprep.subr.mxu1 %v1188_v0  ;;  %v1180_v8 = vld [vmem:[#allocation9 + $0x6e8] sm:$0xff]  ;;  %v1179_v10 = vld [vmem:[#allocation9 + $0x6e0] sm:$0xff]  ;;  %v1142_v55 = vld [vmem:[#allocation9 + $0x5b8] sm:$0xff] }
 0x1c9   : > { %1444 = vmatpush2.msra.mxu0 %v1059_v1  ;;  %1515 = vmatpush2.msra.mxu1 %v1187_v2  ;;  %v1048_v11 = vld [vmem:[#allocation9 + $0x2c8] sm:$0xff]  ;;  %v1047_v13 = vld [vmem:[#allocation9 + $0x2c0] sm:$0xff]  ;;  %v1013_v56 = vld [vmem:[#allocation9 + $0x1b0] sm:$0xff] }
 0x1ca   : > { %1445 = vmatprep.subr.mxu0 %v1056_v3  ;;  %1516 = vmatprep.subr.mxu1 %v1184_v4  ;;  %v1176_v12 = vld [vmem:[#allocation9 + $0x6c8] sm:$0xff]  ;;  %v1175_v14 = vld [vmem:[#allocation9 + $0x6c0] sm:$0xff]  ;;  %v1141_v57 = vld [vmem:[#allocation9 + $0x5b0] sm:$0xff] }
 0x1cb   : > { %1446 = vmatpush2.msra.mxu0 %v1055_v5  ;;  %1517 = vmatpush2.msra.mxu1 %v1183_v6  ;;  %v1044_v15 = vld [vmem:[#allocation9 + $0x2a8] sm:$0xff]  ;;  %v1043_v18 = vld [vmem:[#allocation9 + $0x2a0] sm:$0xff]  ;;  %v1010_v58 = vld [vmem:[#allocation9 + $0x198] sm:$0xff] }
 0x1cc   : > { %1447 = vmatprep.subr.mxu0 %v1052_v7  ;;  %1518 = vmatprep.subr.mxu1 %v1180_v8  ;;  %v1172_v17 = vld [vmem:[#allocation9 + $0x6a8] sm:$0xff]  ;;  %v1171_v19 = vld [vmem:[#allocation9 + $0x6a0] sm:$0xff]  ;;  %v1138_v59 = vld [vmem:[#allocation9 + $0x598] sm:$0xff] }
 0x1cd   : > { %1448 = vmatpush2.msra.mxu0 %v1051_v9  ;;  %1519 = vmatpush2.msra.mxu1 %v1179_v10  ;;  %v1040_v21 = vld [vmem:[#allocation9 + $0x288] sm:$0xff]  ;;  %v1039_v23 = vld [vmem:[#allocation9 + $0x280] sm:$0xff]  ;;  %v1009_v60 = vld [vmem:[#allocation9 + $0x190] sm:$0xff] }
 0x1ce   : > { %1449 = vmatprep.subr.mxu0 %v1048_v11  ;;  %1520 = vmatprep.subr.mxu1 %v1176_v12  ;;  %v1168_v22 = vld [vmem:[#allocation9 + $0x688] sm:$0xff]  ;;  %v1167_v24 = vld [vmem:[#allocation9 + $0x680] sm:$0xff]  ;;  %v1137_v61 = vld [vmem:[#allocation9 + $0x590] sm:$0xff] }
 0x1cf   : > { %1450 = vmatpush2.msra.mxu0 %v1047_v13  ;;  %1521 = vmatpush2.msra.mxu1 %v1175_v14  ;;  %v1036_v25 = vld [vmem:[#allocation9 + $0x268] sm:$0xff]  ;;  %v1035_v28 = vld [vmem:[#allocation9 + $0x260] sm:$0xff]  ;;  %v1006_v62 = vld [vmem:[#allocation9 + $0x178] sm:$0xff] }
 0x1d0   : > { %1451 = vmatprep.subr.mxu0 %v1044_v15  ;;  %1522 = vmatprep.subr.mxu1 %v1172_v17  ;;  %v1164_v26 = vld [vmem:[#allocation9 + $0x668] sm:$0xff]  ;;  %v1163_v29 = vld [vmem:[#allocation9 + $0x660] sm:$0xff]  ;;  %v1134_v63 = vld [vmem:[#allocation9 + $0x578] sm:$0xff] }
 0x1d1   : > { %1452 = vmatpush2.msra.mxu0 %v1043_v18  ;;  %1523 = vmatpush2.msra.mxu1 %v1171_v19  ;;  %v1032_v30 = vld [vmem:[#allocation9 + $0x248] sm:$0xff]  ;;  %v1031_v33 = vld [vmem:[#allocation9 + $0x240] sm:$0xff]  ;;  %v1005_v0 = vld [vmem:[#allocation9 + $0x170] sm:$0xff] }
 0x1d2   : > { %1453 = vmatprep.subr.mxu0 %v1040_v21  ;;  %1524 = vmatprep.subr.mxu1 %v1168_v22  ;;  %v1160_v31 = vld [vmem:[#allocation9 + $0x648] sm:$0xff]  ;;  %v1159_v34 = vld [vmem:[#allocation9 + $0x640] sm:$0xff]  ;;  %v1133_v1 = vld [vmem:[#allocation9 + $0x570] sm:$0xff] }
 0x1d3   : > { %1454 = vmatpush2.msra.mxu0 %v1039_v23  ;;  %1525 = vmatpush2.msra.mxu1 %v1167_v24  ;;  %v1028_v35 = vld [vmem:[#allocation9 + $0x228] sm:$0xff]  ;;  %v1027_v38 = vld [vmem:[#allocation9 + $0x220] sm:$0xff]  ;;  %v1002_v2 = vld [vmem:[#allocation9 + $0x158] sm:$0xff] }
 0x1d4   : > { %1455 = vmatprep.subr.mxu0 %v1036_v25  ;;  %1526 = vmatprep.subr.mxu1 %v1164_v26  ;;  %v1156_v36 = vld [vmem:[#allocation9 + $0x628] sm:$0xff]  ;;  %v1155_v39 = vld [vmem:[#allocation9 + $0x620] sm:$0xff]  ;;  %v1130_v3 = vld [vmem:[#allocation9 + $0x558] sm:$0xff] }
 0x1d5   : > { %1456 = vmatpush2.msra.mxu0 %v1035_v28  ;;  %1527 = vmatpush2.msra.mxu1 %v1163_v29  ;;  %v1024_v40 = vld [vmem:[#allocation9 + $0x208] sm:$0xff]  ;;  %v1023_v43 = vld [vmem:[#allocation9 + $0x200] sm:$0xff]  ;;  %v1001_v4 = vld [vmem:[#allocation9 + $0x150] sm:$0xff] }
 0x1d6   : > { %1457 = vmatprep.subr.mxu0 %v1032_v30  ;;  %1528 = vmatprep.subr.mxu1 %v1160_v31  ;;  %v1152_v41 = vld [vmem:[#allocation9 + $0x608] sm:$0xff]  ;;  %v1151_v44 = vld [vmem:[#allocation9 + $0x600] sm:$0xff]  ;;  %v1129_v5 = vld [vmem:[#allocation9 + $0x550] sm:$0xff] }
 0x1d7   : > { %1458 = vmatpush2.msra.mxu0 %v1031_v33  ;;  %1529 = vmatpush2.msra.mxu1 %v1159_v34  ;;  %v998_v6 = vld [vmem:[#allocation9 + $0x138] sm:$0xff]  ;;  %v997_v8 = vld [vmem:[#allocation9 + $0x130] sm:$0xff] }
 0x1d8   : > { %1459 = vmatprep.subr.mxu0 %v1028_v35  ;;  %1530 = vmatprep.subr.mxu1 %v1156_v36  ;;  %v1126_v7 = vld [vmem:[#allocation9 + $0x538] sm:$0xff]  ;;  %v1125_v9 = vld [vmem:[#allocation9 + $0x530] sm:$0xff] }
 0x1d9   : > { %1460 = vmatpush2.msra.mxu0 %v1027_v38  ;;  %1531 = vmatpush2.msra.mxu1 %v1155_v39  ;;  %v994_v10 = vld [vmem:[#allocation9 + $0x118] sm:$0xff]  ;;  %v993_v12 = vld [vmem:[#allocation9 + $0x110] sm:$0xff] }
 0x1da   : > { %1461 = vmatprep.subr.mxu0 %v1024_v40  ;;  %1532 = vmatprep.subr.mxu1 %v1152_v41  ;;  %v1122_v11 = vld [vmem:[#allocation9 + $0x518] sm:$0xff]  ;;  %v1121_v13 = vld [vmem:[#allocation9 + $0x510] sm:$0xff] }
 0x1db   : > { %1462 = vmatpush2.msra.mxu0 %v1023_v43  ;;  %1463 = vmatprep.mubr.f32.mxu0 %v3037_v42  ;;  %v990_v14 = vld [vmem:[#allocation9 + $0xf8] sm:$0xff]  ;;  %v989_v17 = vld [vmem:[#allocation9 + $0xf0] sm:$0xff] }
 0x1dc   : > { %1533 = vmatpush2.msra.mxu1 %v1151_v44  ;;  %1464 = vmatmul.mubr.f32.vlgmr.msra.gmra.mxu0 %v3030_v32  ;;  %v1118_v15 = vld [vmem:[#allocation9 + $0x4f8] sm:$0xff]  ;;  %v1117_v18 = vld [vmem:[#allocation9 + $0x4f0] sm:$0xff] }
 0x1dd   : > { %1534 = vmatprep.mubr.f32.mxu1 %v3041_v16  ;;  %1541 = vmatprep.subr.mxu0 %v1022_v45  ;;  %v986_v19 = vld [vmem:[#allocation9 + $0xd8] sm:$0xff]  ;;  %v985_v21 = vld [vmem:[#allocation9 + $0xd0] sm:$0xff] }
 0x1de   : > { %1612 = vmatprep.subr.mxu1 %v1150_v46  ;;  %1535 = vmatmul.mubr.f32.vlgmr.msra.gmra.mxu1 %v3033_v37  ;;  %v1113_v22 = vld [vmem:[#allocation9 + $0x4d0] sm:$0xff]  ;;  %v982_v23 = vld [vmem:[#allocation9 + $0xb8] sm:$0xff] }
 0x1df   : > { %1542 = vmatpush1.msra.mxu0 %v1021_v48  ;;  %1613 = vmatpush1.msra.mxu1 %v1149_v49  ;;  %v1110_v24 = vld [vmem:[#allocation9 + $0x4b8] sm:$0xff]  ;;  %v981_v25 = vld [vmem:[#allocation9 + $0xb0] sm:$0xff] }
 0x1e0   : > { %1543 = vmatprep.subr.mxu0 %v1018_v50  ;;  %1614 = vmatprep.subr.mxu1 %v1146_v51  ;;  %v1109_v26 = vld [vmem:[#allocation9 + $0x4b0] sm:$0xff]  ;;  %v1106_v28 = vld [vmem:[#allocation9 + $0x498] sm:$0xff] }
 0x1e1   : > { %1544 = vmatpush1.msra.mxu0 %v1017_v52  ;;  %1615 = vmatpush1.msra.mxu1 %v1145_v53  ;;  %v977_v29 = vld [vmem:[#allocation9 + $0x90] sm:$0xff]  ;;  %v974_v31 = vld [vmem:[#allocation9 + $0x78] sm:$0xff] }
 0x1e2   : > { %1545 = vmatprep.subr.mxu0 %v1014_v54  ;;  %1616 = vmatprep.subr.mxu1 %v1142_v55  ;;  %v1105_v30 = vld [vmem:[#allocation9 + $0x490] sm:$0xff]  ;;  %v1102_v33 = vld [vmem:[#allocation9 + $0x478] sm:$0xff] }
 0x1e3   : > { %1546 = vmatpush1.msra.mxu0 %v1013_v56  ;;  %1617 = vmatpush1.msra.mxu1 %v1141_v57  ;;  %v973_v34 = vld [vmem:[#allocation9 + $0x70] sm:$0xff]  ;;  %v970_v36 = vld [vmem:[#allocation9 + $0x58] sm:$0xff] }
 0x1e4   : > { %1547 = vmatprep.subr.mxu0 %v1010_v58  ;;  %1618 = vmatprep.subr.mxu1 %v1138_v59  ;;  %v1101_v35 = vld [vmem:[#allocation9 + $0x470] sm:$0xff]  ;;  %v1098_v38 = vld [vmem:[#allocation9 + $0x458] sm:$0xff] }
 0x1e5   : > { %1548 = vmatpush1.msra.mxu0 %v1009_v60  ;;  %1619 = vmatpush1.msra.mxu1 %v1137_v61  ;;  %v969_v39 = vld [vmem:[#allocation9 + $0x50] sm:$0xff]  ;;  %v966_v41 = vld [vmem:[#allocation9 + $0x38] sm:$0xff] }
 0x1e6   : > { %1549 = vmatprep.subr.mxu0 %v1006_v62  ;;  %1620 = vmatprep.subr.mxu1 %v1134_v63  ;;  %v1097_v40 = vld [vmem:[#allocation9 + $0x450] sm:$0xff]  ;;  %v1094_v43 = vld [vmem:[#allocation9 + $0x438] sm:$0xff] }
 0x1e7   : > { %1550 = vmatpush1.msra.mxu0 %v1005_v0  ;;  %1621 = vmatpush1.msra.mxu1 %v1133_v1  ;;  %v965_v44 = vld [vmem:[#allocation9 + $0x30] sm:$0xff]  ;;  %v962_v46 = vld [vmem:[#allocation9 + $0x18] sm:$0xff] }
 0x1e8   : > { %1551 = vmatprep.subr.mxu0 %v1002_v2  ;;  %1622 = vmatprep.subr.mxu1 %v1130_v3  ;;  %v1093_v45 = vld [vmem:[#allocation9 + $0x430] sm:$0xff]  ;;  %v1090_v48 = vld [vmem:[#allocation9 + $0x418] sm:$0xff] }
 0x1e9   : > { %1552 = vmatpush1.msra.mxu0 %v1001_v4  ;;  %1623 = vmatpush1.msra.mxu1 %v1129_v5  ;;  %v961_v49 = vld [vmem:[#allocation9 + $0x10] sm:$0xff]  ;;  %v1086_v51 = vld [vmem:[#allocation9 + $0x3f8] sm:$0xff] }
 0x1ea   : > { %1553 = vmatprep.subr.mxu0 %v998_v6  ;;  %1624 = vmatprep.subr.mxu1 %v1126_v7  ;;  %v1089_v50 = vld [vmem:[#allocation9 + $0x410] sm:$0xff]  ;;  %v1214_v52 = vld [vmem:[#allocation9 + $0x7f8] sm:$0xff] }
 0x1eb   : > { %1554 = vmatpush1.msra.mxu0 %v997_v8  ;;  %1625 = vmatpush1.msra.mxu1 %v1125_v9  ;;  %v1085_v53 = vld [vmem:[#allocation9 + $0x3f0] sm:$0xff]  ;;  %v1082_v55 = vld [vmem:[#allocation9 + $0x3d8] sm:$0xff] }
 0x1ec   : > { %1555 = vmatprep.subr.mxu0 %v994_v10  ;;  %1626 = vmatprep.subr.mxu1 %v1122_v11  ;;  %v1213_v54 = vld [vmem:[#allocation9 + $0x7f0] sm:$0xff]  ;;  %v1210_v56 = vld [vmem:[#allocation9 + $0x7d8] sm:$0xff] }
 0x1ed   : > { %1556 = vmatpush1.msra.mxu0 %v993_v12  ;;  %1627 = vmatpush1.msra.mxu1 %v1121_v13  ;;  %v1081_v57 = vld [vmem:[#allocation9 + $0x3d0] sm:$0xff]  ;;  %v1078_v59 = vld [vmem:[#allocation9 + $0x3b8] sm:$0xff] }
 0x1ee   : > { %1557 = vmatprep.subr.mxu0 %v990_v14  ;;  %1628 = vmatprep.subr.mxu1 %v1118_v15  ;;  %v1209_v58 = vld [vmem:[#allocation9 + $0x7d0] sm:$0xff]  ;;  %v1206_v60 = vld [vmem:[#allocation9 + $0x7b8] sm:$0xff] }
 0x1ef   : > { %1558 = vmatpush1.msra.mxu0 %v989_v17  ;;  %1629 = vmatpush1.msra.mxu1 %v1117_v18  ;;  %v1077_v61 = vld [vmem:[#allocation9 + $0x3b0] sm:$0xff]  ;;  %v1074_v63 = vld [vmem:[#allocation9 + $0x398] sm:$0xff] }
 0x1f0   : > { %1559 = vmatprep.subr.mxu0 %v986_v19  ;;  %1630 = vmatprep.subr.mxu1 %v1114_v20  ;;  %v1205_v62 = vld [vmem:[#allocation9 + $0x7b0] sm:$0xff]  ;;  %v1202_v0 = vld [vmem:[#allocation9 + $0x798] sm:$0xff] }
 0x1f1   : > { %1560 = vmatpush1.msra.mxu0 %v985_v21  ;;  %1631 = vmatpush1.msra.mxu1 %v1113_v22  ;;  %v1073_v1 = vld [vmem:[#allocation9 + $0x390] sm:$0xff]  ;;  %v1070_v3 = vld [vmem:[#allocation9 + $0x378] sm:$0xff] }
 0x1f2   : > { %1561 = vmatprep.subr.mxu0 %v982_v23  ;;  %1632 = vmatprep.subr.mxu1 %v1110_v24  ;;  %v1201_v2 = vld [vmem:[#allocation9 + $0x790] sm:$0xff]  ;;  %v1198_v4 = vld [vmem:[#allocation9 + $0x778] sm:$0xff] }
 0x1f3   : > { %1562 = vmatpush1.msra.mxu0 %v981_v25  ;;  %1633 = vmatpush1.msra.mxu1 %v1109_v26  ;;  %v1069_v5 = vld [vmem:[#allocation9 + $0x370] sm:$0xff]  ;;  %v1066_v7 = vld [vmem:[#allocation9 + $0x358] sm:$0xff] }
 0x1f4   : > { %1563 = vmatprep.subr.mxu0 %v978_v27  ;;  %1634 = vmatprep.subr.mxu1 %v1106_v28  ;;  %v1197_v6 = vld [vmem:[#allocation9 + $0x770] sm:$0xff]  ;;  %v1194_v8 = vld [vmem:[#allocation9 + $0x758] sm:$0xff] }
 0x1f5   : > { %1564 = vmatpush1.msra.mxu0 %v977_v29  ;;  %1635 = vmatpush1.msra.mxu1 %v1105_v30  ;;  %v1065_v9 = vld [vmem:[#allocation9 + $0x350] sm:$0xff]  ;;  %v1062_v11 = vld [vmem:[#allocation9 + $0x338] sm:$0xff] }
 0x1f6   : > { %1565 = vmatprep.subr.mxu0 %v974_v31  ;;  %1636 = vmatprep.subr.mxu1 %v1102_v33  ;;  %v1193_v10 = vld [vmem:[#allocation9 + $0x750] sm:$0xff]  ;;  %v1190_v12 = vld [vmem:[#allocation9 + $0x738] sm:$0xff] }
 0x1f7   : > { %1566 = vmatpush1.msra.mxu0 %v973_v34  ;;  %1637 = vmatpush1.msra.mxu1 %v1101_v35  ;;  %v1061_v13 = vld [vmem:[#allocation9 + $0x330] sm:$0xff]  ;;  %v1058_v15 = vld [vmem:[#allocation9 + $0x318] sm:$0xff] }
 0x1f8   : > { %1567 = vmatprep.subr.mxu0 %v970_v36  ;;  %1638 = vmatprep.subr.mxu1 %v1098_v38  ;;  %v1189_v14 = vld [vmem:[#allocation9 + $0x730] sm:$0xff]  ;;  %v1186_v17 = vld [vmem:[#allocation9 + $0x718] sm:$0xff] }
 0x1f9   : > { %1568 = vmatpush1.msra.mxu0 %v969_v39  ;;  %1639 = vmatpush1.msra.mxu1 %v1097_v40  ;;  %v1057_v18 = vld [vmem:[#allocation9 + $0x310] sm:$0xff]  ;;  %v1054_v20 = vld [vmem:[#allocation9 + $0x2f8] sm:$0xff] }
 0x1fa   : > { %1569 = vmatprep.subr.mxu0 %v966_v41  ;;  %1640 = vmatprep.subr.mxu1 %v1094_v43  ;;  %v1185_v19 = vld [vmem:[#allocation9 + $0x710] sm:$0xff]  ;;  %v1182_v21 = vld [vmem:[#allocation9 + $0x6f8] sm:$0xff] }
 0x1fb   : > { %1570 = vmatpush1.msra.mxu0 %v965_v44  ;;  %1641 = vmatpush1.msra.mxu1 %v1093_v45  ;;  %v1053_v22 = vld [vmem:[#allocation9 + $0x2f0] sm:$0xff]  ;;  %v1050_v24 = vld [vmem:[#allocation9 + $0x2d8] sm:$0xff] }
 0x1fc   : > { %1571 = vmatprep.subr.mxu0 %v962_v46  ;;  %1642 = vmatprep.subr.mxu1 %v1090_v48  ;;  %v1181_v23 = vld [vmem:[#allocation9 + $0x6f0] sm:$0xff]  ;;  %v1178_v25 = vld [vmem:[#allocation9 + $0x6d8] sm:$0xff] }
 0x1fd   : > { %1572 = vmatpush1.msra.mxu0 %v961_v49  ;;  %1643 = vmatpush1.msra.mxu1 %v1089_v50  ;;  %v1049_v26 = vld [vmem:[#allocation9 + $0x2d0] sm:$0xff]  ;;  %v1046_v28 = vld [vmem:[#allocation9 + $0x2b8] sm:$0xff] }
 0x1fe   : > { %1573 = vmatprep.subr.mxu0 %v1086_v51  ;;  %1644 = vmatprep.subr.mxu1 %v1214_v52  ;;  %v1177_v27 = vld [vmem:[#allocation9 + $0x6d0] sm:$0xff]  ;;  %v1174_v29 = vld [vmem:[#allocation9 + $0x6b8] sm:$0xff] }
 0x1ff   : > { %1574 = vmatpush2.msra.mxu0 %v1085_v53  ;;  %1645 = vmatpush2.msra.mxu1 %v1213_v54  ;;  %v1045_v30 = vld [vmem:[#allocation9 + $0x2b0] sm:$0xff]  ;;  %v1042_v33 = vld [vmem:[#allocation9 + $0x298] sm:$0xff] }
 0x200   : > { %1575 = vmatprep.subr.mxu0 %v1082_v55  ;;  %1646 = vmatprep.subr.mxu1 %v1210_v56  ;;  %v1173_v31 = vld [vmem:[#allocation9 + $0x6b0] sm:$0xff]  ;;  %v1170_v34 = vld [vmem:[#allocation9 + $0x698] sm:$0xff]  ;;  %v1744_v56 = vld [vmem:[#allocation12 + $0xf8] sm:$0xff] }
 0x201   : > { %1576 = vmatpush2.msra.mxu0 %v1081_v57  ;;  %1647 = vmatpush2.msra.mxu1 %v1209_v58  ;;  %v1041_v35 = vld [vmem:[#allocation9 + $0x290] sm:$0xff]  ;;  %v1038_v38 = vld [vmem:[#allocation9 + $0x278] sm:$0xff]  ;;  %v1728_v57 = vld [vmem:[#allocation12 + $0x78] sm:$0xff] }
 0x202   : > { %1577 = vmatprep.subr.mxu0 %v1078_v59  ;;  %1648 = vmatprep.subr.mxu1 %v1206_v60  ;;  %v1169_v36 = vld [vmem:[#allocation9 + $0x690] sm:$0xff]  ;;  %v1166_v39 = vld [vmem:[#allocation9 + $0x678] sm:$0xff]  ;;  %v1743_v58 = vld [vmem:[#allocation12 + $0xf0] sm:$0xff] }
 0x203   : > { %1578 = vmatpush2.msra.mxu0 %v1077_v61  ;;  %1649 = vmatpush2.msra.mxu1 %v1205_v62  ;;  %v1037_v40 = vld [vmem:[#allocation9 + $0x270] sm:$0xff]  ;;  %v1034_v43 = vld [vmem:[#allocation9 + $0x258] sm:$0xff]  ;;  %v1727_v59 = vld [vmem:[#allocation12 + $0x70] sm:$0xff] }
 0x204   : > { %1579 = vmatprep.subr.mxu0 %v1074_v63  ;;  %1650 = vmatprep.subr.mxu1 %v1202_v0  ;;  %v1165_v41 = vld [vmem:[#allocation9 + $0x670] sm:$0xff]  ;;  %v1162_v44 = vld [vmem:[#allocation9 + $0x658] sm:$0xff]  ;;  %v1740_v63 = vld [vmem:[#allocation12 + $0xd8] sm:$0xff] }
 0x205   : > { %1580 = vmatpush2.msra.mxu0 %v1073_v1  ;;  %1651 = vmatpush2.msra.mxu1 %v1201_v2  ;;  %v1033_v45 = vld [vmem:[#allocation9 + $0x250] sm:$0xff]  ;;  %v1030_v48 = vld [vmem:[#allocation9 + $0x238] sm:$0xff]  ;;  %v1739_v0 = vld [vmem:[#allocation12 + $0xd0] sm:$0xff] }
 0x206   : > { %1581 = vmatprep.subr.mxu0 %v1070_v3  ;;  %1652 = vmatprep.subr.mxu1 %v1198_v4  ;;  %v1161_v46 = vld [vmem:[#allocation9 + $0x650] sm:$0xff]  ;;  %v1158_v49 = vld [vmem:[#allocation9 + $0x638] sm:$0xff]  ;;  %v1760_v1 = vld [vmem:[#allocation12 + $0x178] sm:$0xff] }
 0x207   : > { %1582 = vmatpush2.msra.mxu0 %v1069_v5  ;;  %1653 = vmatpush2.msra.mxu1 %v1197_v6  ;;  %v1029_v50 = vld [vmem:[#allocation9 + $0x230] sm:$0xff]  ;;  %v1026_v52 = vld [vmem:[#allocation9 + $0x218] sm:$0xff]  ;;  %v1775_v2 = vld [vmem:[#allocation12 + $0x1f0] sm:$0xff] }
 0x208   : > { %1583 = vmatprep.subr.mxu0 %v1066_v7  ;;  %1654 = vmatprep.subr.mxu1 %v1194_v8  ;;  %v1157_v51 = vld [vmem:[#allocation9 + $0x630] sm:$0xff]  ;;  %v1154_v53 = vld [vmem:[#allocation9 + $0x618] sm:$0xff]  ;;  %v1759_v4 = vld [vmem:[#allocation12 + $0x170] sm:$0xff] }
 0x209   : > { %1584 = vmatpush2.msra.mxu0 %v1065_v9  ;;  %1655 = vmatpush2.msra.mxu1 %v1193_v10  ;;  %v1025_v54 = vld [vmem:[#allocation9 + $0x210] sm:$0xff]  ;;  %v1742_v60 = vld [vmem:[#allocation12 + $0xe8] sm:$0xff] }
 0x20a   : > { %1585 = vmatprep.subr.mxu0 %v1062_v11  ;;  %1656 = vmatprep.subr.mxu1 %v1190_v12  ;;  %v1153_v55 = vld [vmem:[#allocation9 + $0x610] sm:$0xff]  ;;  %v1726_v61 = vld [vmem:[#allocation12 + $0x68] sm:$0xff]  ;;  %v1736_v11 = vld [vmem:[#allocation12 + $0xb8] sm:$0xff] }
 0x20b   : > { %1586 = vmatpush2.msra.mxu0 %v1061_v13  ;;  %1657 = vmatpush2.msra.mxu1 %v1189_v14  ;;  %v1741_v62 = vld [vmem:[#allocation12 + $0xe0] sm:$0xff]  ;;  %v1738_v3 = vld [vmem:[#allocation12 + $0xc8] sm:$0xff]  ;;  %v1720_v13 = vld [vmem:[#allocation12 + $0x38] sm:$0xff] }
 0x20c   : > { %1587 = vmatprep.subr.mxu0 %v1058_v15  ;;  %1658 = vmatprep.subr.mxu1 %v1186_v17  ;;  %v1722_v5 = vld [vmem:[#allocation12 + $0x48] sm:$0xff]  ;;  %v1737_v7 = vld [vmem:[#allocation12 + $0xc0] sm:$0xff]  ;;  %v1772_v14 = vld [vmem:[#allocation12 + $0x1d8] sm:$0xff] }
 0x20d   : > { %1588 = vmatpush2.msra.mxu0 %v1057_v18  ;;  %1659 = vmatpush2.msra.mxu1 %v1185_v19  ;;  %v1774_v6 = vld [vmem:[#allocation12 + $0x1e8] sm:$0xff]  ;;  %v1721_v9 = vld [vmem:[#allocation12 + $0x40] sm:$0xff]  ;;  %v1735_v15 = vld [vmem:[#allocation12 + $0xb0] sm:$0xff] }
 0x20e   : > { %1589 = vmatprep.subr.mxu0 %v1054_v20  ;;  %1660 = vmatprep.subr.mxu1 %v1182_v21  ;;  %v1758_v8 = vld [vmem:[#allocation12 + $0x168] sm:$0xff]  ;;  %v1773_v10 = vld [vmem:[#allocation12 + $0x1e0] sm:$0xff]  ;;  %v1756_v17 = vld [vmem:[#allocation12 + $0x158] sm:$0xff] }
 0x20f   : > { %1590 = vmatpush2.msra.mxu0 %v1053_v22  ;;  %1661 = vmatpush2.msra.mxu1 %v1181_v23  ;;  %v1757_v12 = vld [vmem:[#allocation12 + $0x160] sm:$0xff]  ;;  %v1719_v18 = vld [vmem:[#allocation12 + $0x30] sm:$0xff]  ;;  %v1734_v20 = vld [vmem:[#allocation12 + $0xa8] sm:$0xff] }
 0x210   : > { %1591 = vmatprep.subr.mxu0 %v1050_v24  ;;  %1662 = vmatprep.subr.mxu1 %v1178_v25  ;;  %v1771_v19 = vld [vmem:[#allocation12 + $0x1d0] sm:$0xff]  ;;  %v1718_v22 = vld [vmem:[#allocation12 + $0x28] sm:$0xff]  ;;  %v1733_v24 = vld [vmem:[#allocation12 + $0xa0] sm:$0xff] }
 0x211   : > { %1592 = vmatpush2.msra.mxu0 %v1049_v26  ;;  %1663 = vmatpush2.msra.mxu1 %v1177_v27  ;;  %v1755_v21 = vld [vmem:[#allocation12 + $0x150] sm:$0xff]  ;;  %v1770_v23 = vld [vmem:[#allocation12 + $0x1c8] sm:$0xff]  ;;  %v1717_v26 = vld [vmem:[#allocation12 + $0x20] sm:$0xff] }
 0x212   : > { %1593 = vmatprep.subr.mxu0 %v1046_v28  ;;  %1664 = vmatprep.subr.mxu1 %v1174_v29  ;;  %v1754_v25 = vld [vmem:[#allocation12 + $0x148] sm:$0xff]  ;;  %v1769_v27 = vld [vmem:[#allocation12 + $0x1c0] sm:$0xff]  ;;  %v1732_v28 = vld [vmem:[#allocation12 + $0x98] sm:$0xff] }
 0x213   : > { %1594 = vmatpush2.msra.mxu0 %v1045_v30  ;;  %1665 = vmatpush2.msra.mxu1 %v1173_v31  ;;  %v1753_v29 = vld [vmem:[#allocation12 + $0x140] sm:$0xff]  ;;  %v1716_v30 = vld [vmem:[#allocation12 + $0x18] sm:$0xff] }
 0x214   : > { %1595 = vmatprep.subr.mxu0 %v1042_v33  ;;  %1666 = vmatprep.subr.mxu1 %v1170_v34  ;;  %v1768_v31 = vld [vmem:[#allocation12 + $0x1b8] sm:$0xff]  ;;  %v1731_v33 = vld [vmem:[#allocation12 + $0x90] sm:$0xff] }
 0x215   : > { %1596 = vmatpush2.msra.mxu0 %v1041_v35  ;;  %1667 = vmatpush2.msra.mxu1 %v1169_v36  ;;  %v1752_v34 = vld [vmem:[#allocation12 + $0x138] sm:$0xff]  ;;  %v1715_v35 = vld [vmem:[#allocation12 + $0x10] sm:$0xff] }
 0x216   : > { %1597 = vmatprep.subr.mxu0 %v1038_v38  ;;  %1668 = vmatprep.subr.mxu1 %v1166_v39  ;;  %v1767_v36 = vld [vmem:[#allocation12 + $0x1b0] sm:$0xff]  ;;  %v1730_v38 = vld [vmem:[#allocation12 + $0x88] sm:$0xff] }
 0x217   : > { %1598 = vmatpush2.msra.mxu0 %v1037_v40  ;;  %1669 = vmatpush2.msra.mxu1 %v1165_v41  ;;  %v1751_v39 = vld [vmem:[#allocation12 + $0x130] sm:$0xff]  ;;  %v1714_v40 = vld [vmem:[#allocation12 + $0x8] sm:$0xff]  ;;  %v1729_v41 = vld [vmem:[#allocation12 + $0x80] sm:$0xff] }
 0x218   : > { %1599 = vmatprep.subr.mxu0 %v1034_v43  ;;  %1670 = vmatprep.subr.mxu1 %v1162_v44  ;;  %v1713_v43 = vld [vmem:[#allocation12] sm:$0xff]  ;;  %v1766_v44 = vld [vmem:[#allocation12 + $0x1a8] sm:$0xff] }
 0x219   : > { %1600 = vmatpush2.msra.mxu0 %v1033_v45  ;;  %1671 = vmatpush2.msra.mxu1 %v1161_v46  ;;  %v1750_v45 = vld [vmem:[#allocation12 + $0x128] sm:$0xff]  ;;  %v1765_v46 = vld [vmem:[#allocation12 + $0x1a0] sm:$0xff] }
 0x21a   : > { %1601 = vmatprep.subr.mxu0 %v1030_v48  ;;  %1672 = vmatprep.subr.mxu1 %v1158_v49  ;;  %v1749_v48 = vld [vmem:[#allocation12 + $0x120] sm:$0xff]  ;;  %v1764_v49 = vld [vmem:[#allocation12 + $0x198] sm:$0xff] }
 0x21b   : > { %1602 = vmatpush2.msra.mxu0 %v1029_v50  ;;  %1673 = vmatpush2.msra.mxu1 %v1157_v51  ;;  %v1748_v50 = vld [vmem:[#allocation12 + $0x118] sm:$0xff]  ;;  %v1763_v51 = vld [vmem:[#allocation12 + $0x190] sm:$0xff] }
 0x21c   : > { %1603 = vmatprep.subr.mxu0 %v1026_v52  ;;  %1674 = vmatprep.subr.mxu1 %v1154_v53  ;;  %v1747_v52 = vld [vmem:[#allocation12 + $0x110] sm:$0xff]  ;;  %v1762_v53 = vld [vmem:[#allocation12 + $0x188] sm:$0xff] }
 0x21d   : > { %1604 = vmatpush2.msra.mxu0 %v1025_v54  ;;  %1605 = vmatprep.mubr.f32.mxu0 %v3037_v42  ;;  %v1725_v42 = vld [vmem:[#allocation12 + $0x60] sm:$0xff]  ;;  %v1746_v54 = vld [vmem:[#allocation12 + $0x108] sm:$0xff] }
 0x21e   : > { %1675 = vmatpush2.msra.mxu1 %v1153_v55  ;;  %1676 = vmatprep.mubr.f32.mxu1 %v3041_v16  ;;  %v1724_v16 = vld [vmem:[#allocation12 + $0x58] sm:$0xff]  ;;  %v1761_v55 = vld [vmem:[#allocation12 + $0x180] sm:$0xff] }
 0x21f   : > { %1606 = vmatmul.mubr.f32.vlgmr.msra.gmra.mxu0 %v3030_v32  ;;  %1677 = vmatmul.mubr.f32.vlgmr.msra.gmra.mxu1 %v3033_v37  ;;  %v1723_v32 = vld [vmem:[#allocation12 + $0x50] sm:$0xff]  ;;  %v1776_v37 = vld [vmem:[#allocation12 + $0x1f8] sm:$0xff] }
 0x220   : > { %2167 = vmatprep.subr.mxu0 %v1744_v56  ;;  %2202 = vmatprep.subr.mxu1 %v1776_v37  ;;  %v1745_v56 = vld [vmem:[#allocation12 + $0x100] sm:$0xff] }
 0x221   : > { %2168 = vmatpush3.msra.mxu0 %v1728_v57  ;;  %2203 = vmatpush3.msra.mxu1 %v1760_v1 }
 0x222   : > { %2169 = vmatprep.subr.mxu0 %v1743_v58  ;;  %2204 = vmatprep.subr.mxu1 %v1775_v2 }
 0x223   : > { %2170 = vmatpush3.msra.mxu0 %v1727_v59  ;;  %2205 = vmatpush3.msra.mxu1 %v1759_v4 }
 0x224   : > { %2171 = vmatprep.subr.mxu0 %v1742_v60  ;;  %2206 = vmatprep.subr.mxu1 %v1774_v6  ;;  %v1687_v60 = vsub.s32 0, %v2996_v47 }
 0x225   : > { %2172 = vmatpush3.msra.mxu0 %v1726_v61  ;;  %2207 = vmatpush3.msra.mxu1 %v1758_v8  ;;  %v1683_v61 = vld [vmem:[%s3096_s5] sm:$0xf] }
 0x226   : > { %2173 = vmatprep.subr.mxu0 %v1741_v62  ;;  %2208 = vmatprep.subr.mxu1 %v1773_v10  ;;  %v1691_v62 = vsub.s32 1, %v2996_v47  ;;  %v1695_v10 = vsub.s32 2, %v2996_v47 }
 0x227   : > { %2174 = vmatpush3.msra.mxu0 %v1725_v42  ;;  %2209 = vmatpush3.msra.mxu1 %v1757_v12 }
 0x228   : > { %2175 = vmatprep.subr.mxu0 %v1740_v63  ;;  %2210 = vmatprep.subr.mxu1 %v1772_v14 }
 0x229   : > { %2176 = vmatpush3.msra.mxu0 %v1724_v16  ;;  %2211 = vmatpush3.msra.mxu1 %v1756_v17 }
 0x22a   : > { %2177 = vmatprep.subr.mxu0 %v1739_v0  ;;  %2212 = vmatprep.subr.mxu1 %v1771_v19 }
 0x22b   : > { %2178 = vmatpush3.msra.mxu0 %v1723_v32  ;;  %2213 = vmatpush3.msra.mxu1 %v1755_v21  ;;  %v1688_v32 = vrot.slane %v1683_v61, %v1687_v60 }
 0x22c   : > { %2179 = vmatprep.subr.mxu0 %v1738_v3  ;;  %2214 = vmatprep.subr.mxu1 %v1770_v23  ;;  %v1692_v3 = vrot.slane %v1683_v61, %v1691_v62 }
 0x22d   : > { %2180 = vmatpush3.msra.mxu0 %v1722_v5  ;;  %2215 = vmatpush3.msra.mxu1 %v1754_v25 }
 0x22e   : > { %2181 = vmatprep.subr.mxu0 %v1737_v7  ;;  %2216 = vmatprep.subr.mxu1 %v1769_v27 }
 0x22f   : > { %2182 = vmatpush3.msra.mxu0 %v1721_v9  ;;  %2217 = vmatpush3.msra.mxu1 %v1753_v29 }
 0x230   : > { %2183 = vmatprep.subr.mxu0 %v1736_v11  ;;  %2218 = vmatprep.subr.mxu1 %v1768_v31  ;;  %v1699_v11 = vsub.s32 3, %v2996_v47  ;;  %v2158_v47 = vld [vmem:[%s3098_s7] ss:$0 sm:$0xff] }
 0x231   : > { %2184 = vmatpush3.msra.mxu0 %v1720_v13  ;;  %2219 = vmatpush3.msra.mxu1 %v1752_v34 }
 0x232   : > { %2185 = vmatprep.subr.mxu0 %v1735_v15  ;;  %2220 = vmatprep.subr.mxu1 %v1767_v36  ;;  %v1696_v15 = vrot.slane %v1683_v61, %v1695_v10 }
 0x233   : > { %2186 = vmatpush3.msra.mxu0 %v1719_v18  ;;  %2221 = vmatpush3.msra.mxu1 %v1751_v39 }
 0x234   : > { %2187 = vmatprep.subr.mxu0 %v1734_v20  ;;  %2222 = vmatprep.subr.mxu1 %v1766_v44  ;;  %v1700_v20 = vrot.slane %v1683_v61, %v1699_v11 }
 0x235   : > { %2188 = vmatpush3.msra.mxu0 %v1718_v22  ;;  %2223 = vmatpush3.msra.mxu1 %v1750_v45 }
 0x236   : > { %2189 = vmatprep.subr.mxu0 %v1733_v24  ;;  %2224 = vmatprep.subr.mxu1 %v1765_v46 }
 0x237   : > { %2190 = vmatpush3.msra.mxu0 %v1717_v26  ;;  %2225 = vmatpush3.msra.mxu1 %v1749_v48 }
 0x238   : > { %2191 = vmatprep.subr.mxu0 %v1732_v28  ;;  %2226 = vmatprep.subr.mxu1 %v1764_v49 }
 0x239   : > { %2192 = vmatpush3.msra.mxu0 %v1716_v30  ;;  %2227 = vmatpush3.msra.mxu1 %v1748_v50 }
 0x23a   : > { %2193 = vmatprep.subr.mxu0 %v1731_v33  ;;  %2228 = vmatprep.subr.mxu1 %v1763_v51 }
 0x23b   : > { %2194 = vmatpush3.msra.mxu0 %v1715_v35  ;;  %2229 = vmatpush3.msra.mxu1 %v1747_v52 }
 0x23c   : > { %2195 = vmatprep.subr.mxu0 %v1730_v38  ;;  %2230 = vmatprep.subr.mxu1 %v1762_v53 }
 0x23d   : > { %2196 = vmatpush3.msra.mxu0 %v1714_v40  ;;  %2231 = vmatpush3.msra.mxu1 %v1746_v54 }
 0x23e   : > { %2197 = vmatprep.subr.mxu0 %v1729_v41  ;;  %2232 = vmatprep.subr.mxu1 %v1761_v55 }
 0x23f   : > { %2198 = vmatpush3.msra.mxu0 %v1713_v43  ;;  %2233 = vmatpush3.msra.mxu1 %v1745_v56 }
 0x25b   : > { %v1301_v57 = vpop.f32.mrf.mxu0 }
 0x25c   : > { %v1372_v58 = vpop.f32.mrf.mxu1 }
 0x25d   : > { %v1303_v59 = vpop.f32.mrf.mxu0 }
 0x25e   : > { %v1374_v42 = vpop.f32.mrf.mxu1 }
 0x29c   : > { %v1465_v63 = vpop.f32.mrf.mxu0 }
 0x29d   : > { %v1466_v16 = vadd.f32 %v1465_v63, %v1301_v57 }
 0x29e   : > { %v1536_v0 = vpop.f32.mrf.mxu1  ;;  %v1467_v37 = vpop.f32.mrf.mxu0 }
 0x29f   : > { %v1537_v1 = vadd.f32 %v1536_v0, %v1466_v16  ;;  %v1468_v2 = vadd.f32 %v1467_v37, %v1303_v59 }
 0x2a0   : > { %v1538_v4 = vpop.f32.mrf.mxu1 }
 0x2a1   : > { %v1539_v5 = vadd.f32 %v1538_v4, %v1468_v2  ;;  %v1705_v6 = vadd.f32 %v1688_v32, %v1537_v1 }
 0x2a3   : > { %v1706_v7 = vadd.f32 %v1692_v3, %v1539_v5  ;;  %v1709_v9 = vmax.f32 %v1705_v6, 0.0 }
 0x2a5   : > { %v1710_v8 = vmax.f32 %v1706_v7, 0.0 }
 0x2a7   : > { %1848 = vmatprep.mubr.f32.mxu0 %v1710_v8 }
 0x2a8   : > { %1849 = vmatmul.mubr.f32.vlgmr.msra.gmra.mxu0 %v1709_v9 }
 0x2df   : > { %v1607_v12 = vpop.f32.mrf.mxu0  ;;  %v1678_v13 = vpop.f32.mrf.mxu1 }
 0x2e0   : > { %v1608_v14 = vadd.f32 %v1607_v12, %v1372_v58 }
 0x2e1   : > { %v1609_v17 = vpop.f32.mrf.mxu0  ;;  %v1680_v21 = vpop.f32.mrf.mxu1 }
 0x2e2   : > { %v1679_v18 = vadd.f32 %v1678_v13, %v1608_v14  ;;  %v1610_v19 = vadd.f32 %v1609_v17, %v1374_v42 }
 0x2e4   : > { %v1681_v22 = vadd.f32 %v1680_v21, %v1610_v19  ;;  %v1707_v23 = vadd.f32 %v1696_v15, %v1679_v18 }
 0x2e6   : > { %v1708_v24 = vadd.f32 %v1700_v20, %v1681_v22  ;;  %v1711_v26 = vmax.f32 %v1707_v23, 0.0 }
 0x2e8   : > { %v1712_v25 = vmax.f32 %v1708_v24, 0.0 }
 0x2ea   : > { %1918 = vmatprep.mubr.f32.mxu1 %v1712_v25 }
 0x2eb   : > { %1919 = vmatmul.mubr.f32.vlgmr.msra.gmra.mxu1 %v1711_v26 }
 0x368   : > { %v2199_v27 = vpop.f32.mrf.mxu0 }
 0x36a   : > { %v2200_v28 = vpop.f32.mrf.mxu0 }
 0x36b   : > { %v2201_v29 = vadd.f32 %v2200_v28, %v2199_v27 }
 0x36d   : > { %v1851_v33 = vadd.f32 %v2201_v29, %v2158_v47 }
 0x3ab   : > { %v2234_v30 = vpop.f32.mrf.mxu1 }
 0x3ad   : > { %v2235_v31 = vpop.f32.mrf.mxu1 }
 0x3ae   : > { %v2236_v34 = vadd.f32 %v2235_v31, %v2234_v30 }
 0x3b0   : > { %v1921_v35 = vadd.f32 %v2236_v34, %v1851_v33 }
 0x3b2   : > { %v2159_v36 = vmul.f32 -1.442695, %v1921_v35 }
 0x3b4   : > { %2454 = vpow2.f32 %v2159_v36 }
 0x3c1   : > { %v2455_v38 = vpop.eup %2454 }
 0x3c2   : > { %v1927_v39 = vadd.f32 1.0, %v2455_v38 }
 0x3c4   : > { %2456 = vrcp.f32 %v1927_v39 }
 0x3d1   : > { %v2457_v40 = vpop.eup %2456 }
 0x3d2   : > { %1930 = vst [vmem:[#allocation13] sm:$0x3] %v2457_v40 }
 0x3d3 PF: > { %p2290_p10 = scmp.eq.s32.totalorder %s2807_s11, 3  ;;  %s2730_s20 = smov [#allocation13]  }
 0x3d4   : > { %s1940_s22 = sshll.u32 %s2730_s20, 4  ;;  %s1941_s22 = int_to_ptr.vmem [resolvable:$true] %s1940_s22 }
 0x3d5   : > { %s2618_s14 = scalar_lea.vmem %s1941_s22, 32  ;;  %p2625_p2 = scmp.lt.s32.totalorder %s1941_s22, %s1941_s22 }
 0x3d6   : > { %p2619_p11 = scmp.ne.s32.totalorder %s1941_s22, %s2618_s14  ;;  %p2626_p5 = scmp.lt.s32.totalorder %s2618_s14, %s2618_s14 }
 0x3d8   : > { %p2620_p12 = pnand %p2619_p11, %p2290_p10  ;;  %p2627_p4 = por %p2626_p5, %p2625_p2 }
 0x3da   : > { %p2621_p0 = pneg %p2620_p12 }
 0x3dc   : > { %p2628_p7 = pnand %p2627_p4, %p2621_p0 }
 0x3de   : > { %2631 = shalt.err (!%p2628_p7)
}
 0x3df   : > { %2258 = dma.vmem_to_hbm [thread:$0]  (%p2290_p10), %s1941_s22, 32, %s3099_s8, [#allocation5]  }
 0x3e0   : > { %2687 = dma.done.wait (%p2290_p10), [#allocation5], 32  }
 0x3e1   : > { %2689 = vsyncadd (%p2290_p10), [#allocation5], 4294967264 }
 0x3e2 PF: > { %s24_s10 = sadd.s32 1, %s2712_s10   ;;  %s3123_s16 = sld [smem:[#allocation20_spill]] }
 0x3e3   : > { %p21_p8 = scmp.ge.s32.totalorder %s24_s10, 6   ;;  %s3124_s27 = smov %s2696_s28 }
 0x3e4   : > { %s3125_s28 = smov %s2700_s29  ;;  %s3126_s29 = smov %s2867_s18 }
 0x3e5   : > { %s3127_s30 = smov %s2708_s9  ;;  %23 = sbr.rel (!%p21_p8) target bundleno = 11 (0xb), region = 126 }
 0x3e8   : > { %s3128_s9 = smov %s3123_s16 }
 0x3ea   :  { %1953 = vsyncpa [#allocation4], 1 }
 0x3eb   :  { %1955 = vsyncpa [#allocation4 + $0x1], 1 }
 0x3ec   :  { %1956 = vsyncpa [#allocation7], 1 }
 0x3ed   :  { %1957 = vsyncpa [#allocation11], 1 }
 0x3ee   :  { %1958 = vsyncpa [#allocation5], 1 }
 0x3ef   :  { %1960 = vsyncpa [#allocation5 + $0x1], 1 }

</bundles_post_ra>
